<compile_context>
chip_gen: v6e
topology: v6e:2x2x1
jax: 0.10.0
libtpu: 0.0.40
codegen_flags: <defaults>
</compile_context>

<pallas_src>
import functools

import jax
import jax.numpy as jnp
from jax.experimental import pallas as pl
from jax.experimental.pallas import tpu as pltpu

# Module hyper-parameters (small-scale, same structure as the PyTorch code).
MAXLEN = 16          # stands in for maxlen = 2000
VOCAB_SIZE = 50
EMBED_DIM = 64
FILTER_NUM = 100
KERNEL_LIST = (3, 4, 5)
HID1 = 64
HID2 = 32

# Padded / packed sizes.
F_PAD = 128                      # FILTER_NUM padded to a full lane tile
V_PAD = 128                      # vocab padded; pad ids map to an all-zero row
KMAX = max(KERNEL_LIST)
NK = len(KERNEL_LIST)
KC = KMAX * EMBED_DIM            # fused im2col contraction (320)
FC = NK * F_PAD                  # fused conv output lanes (384)

BB_MAX = 16                      # BB_MAX * L_C = 256 -> full MXU M pass (v6e/v7x)


def _round_up(x, m):
    return (x + m - 1) // m * m


L_C = _round_up(MAXLEN, 8)                       # conv positions computed (16)
L_PAD = _round_up(L_C + KMAX - 1, 8)             # padded sequence length (24)


def textcnn_kernel(tok_ref, table_ref, wconv_ref, bconv_ref,
                   wl1_ref, bl1_ref, wl2_ref, bl2_ref, wl3_ref, bl3_ref,
                   out_ref, *, seq_len):
    """One batch block (bb examples); everything is VMEM resident."""
    ntok = tok_ref.shape[0]                      # bb * L_PAD
    bb = ntok // L_PAD

    # ---- embedding gather as a one-hot x bf16 table matmul (MXU) -----------
    tok = tok_ref[...]                                           # (bb*L_PAD, 1) i32
    vid = jax.lax.broadcasted_iota(jnp.int32, (ntok, V_PAD), 1)
    onehot = (tok == vid).astype(jnp.bfloat16)
    emb = jnp.dot(onehot, table_ref[...],
                  preferred_element_type=jnp.float32).astype(jnp.bfloat16)
    emb = emb.reshape(bb, L_PAD, EMBED_DIM)                      # bf16, lossless

    # ---- fused conv branches: one shared k=KMAX im2col, one matmul ---------
    # patches: (bb*L_C, KMAX*E).  Branch k's weight rows beyond its window are
    # zero, so one (bb*L_C, 320) @ (320, 384) dot computes all three branches.
    cols = [emb[:, i:i + L_C, :].reshape(bb * L_C, EMBED_DIM)
            for i in range(KMAX)]
    patches = jnp.concatenate(cols, axis=-1)                     # bf16
    conv = jnp.dot(patches, wconv_ref[...],
                   preferred_element_type=jnp.float32)           # (bb*L_C, 384) f32
    conv = conv.reshape(bb, L_C, FC)

    # Per-branch masked global max over positions (only t < L - k + 1 valid).
    # Bias-add and ReLU commute with the max -> applied after pooling.
    pos = jax.lax.broadcasted_iota(jnp.int32, (bb, L_C, 1), 1)
    pooled = []
    for j, k in enumerate(KERNEL_LIST):
        branch = conv[:, :, j * F_PAD:(j + 1) * F_PAD]           # lane slice
        branch = jnp.where(pos < seq_len - k + 1, branch, -1e30)
        pooled.append(jnp.max(branch, axis=1))                   # (bb, F_PAD)
    feat = jnp.maximum(jnp.concatenate(pooled, axis=-1) + bconv_ref[...], 0.0)
    feat = feat.astype(jnp.bfloat16)                             # (bb, 384)

    # ---- MLP head (dropout is identity at inference) ------------------------
    h1 = jnp.dot(feat, wl1_ref[...],
                 preferred_element_type=jnp.float32) + bl1_ref[...]
    h1 = jnp.maximum(h1, 0.0)
    h2 = jnp.dot(h1.astype(jnp.bfloat16), wl2_ref[...],
                 preferred_element_type=jnp.float32) + bl2_ref[...]
    h2 = jnp.maximum(h2, 0.0)
    logit = jnp.dot(h2.astype(jnp.bfloat16), wl3_ref[...],
                    preferred_element_type=jnp.float32) + bl3_ref[...]
    out_ref[...] = jax.nn.sigmoid(logit)                          # (bb, 1) f32


def init_logical_params(key):
    """Parameters in the PyTorch layout (unpadded, f32)."""
    ks = jax.random.split(key, 14)
    s = 0.1
    p = {'embedding': jax.random.normal(ks[0], (VOCAB_SIZE, EMBED_DIM), jnp.float32)}
    for j, k in enumerate(KERNEL_LIST):
        p[f'conv{k}_w'] = s * jax.random.normal(ks[1 + 2 * j],
                                                (FILTER_NUM, k, EMBED_DIM), jnp.float32)
        p[f'conv{k}_b'] = s * jax.random.normal(ks[2 + 2 * j], (FILTER_NUM,), jnp.float32)
    p['lin1_w'] = s * jax.random.normal(ks[7], (HID1, FILTER_NUM * NK), jnp.float32)
    p['lin1_b'] = s * jax.random.normal(ks[8], (HID1,), jnp.float32)
    p['lin2_w'] = s * jax.random.normal(ks[9], (HID2, HID1), jnp.float32)
    p['lin2_b'] = s * jax.random.normal(ks[10], (HID2,), jnp.float32)
    p['lin3_w'] = s * jax.random.normal(ks[11], (1, HID2), jnp.float32)
    p['lin3_b'] = s * jax.random.normal(ks[12], (1,), jnp.float32)
    return p


def pack_params(lp):
    """Pad / transpose / fuse / cast parameters into the kernel layout."""
    packed = {}
    table = jnp.zeros((V_PAD, EMBED_DIM), jnp.float32).at[:VOCAB_SIZE].set(lp['embedding'])
    packed['table'] = table.astype(jnp.bfloat16)

    # Fused conv weight (KMAX*E, NK*F_PAD): branch j occupies lanes
    # [j*F_PAD, j*F_PAD+FILTER_NUM); rows for window offsets >= k_j are zero.
    wconv = jnp.zeros((KC, FC), jnp.float32)
    bconv = jnp.zeros((1, FC), jnp.float32)
    for j, k in enumerate(KERNEL_LIST):
        Wk = lp[f'conv{k}_w']                                    # (F, k, E)
        for i in range(k):
            wconv = wconv.at[i * EMBED_DIM:(i + 1) * EMBED_DIM,
                             j * F_PAD:j * F_PAD + FILTER_NUM].set(Wk[:, i, :].T)
        bconv = bconv.at[0, j * F_PAD:j * F_PAD + FILTER_NUM].set(lp[f'conv{k}_b'])
    packed['wconv'] = wconv.astype(jnp.bfloat16)
    packed['bconv'] = bconv

    # lin1: torch (HID1, 3*F) -> padded (3*F_PAD, HID1); padded rows are zero.
    w1t = lp['lin1_w'].T                                          # (3*F, HID1)
    wl1 = jnp.zeros((FC, HID1), jnp.float32)
    for j in range(NK):
        wl1 = wl1.at[j * F_PAD:j * F_PAD + FILTER_NUM, :].set(
            w1t[j * FILTER_NUM:(j + 1) * FILTER_NUM, :])
    packed['wl1'] = wl1.astype(jnp.bfloat16)
    packed['bl1'] = lp['lin1_b'].reshape(1, HID1)
    packed['wl2'] = lp['lin2_w'].T.astype(jnp.bfloat16)           # (HID1, HID2)
    packed['bl2'] = lp['lin2_b'].reshape(1, HID2)
    packed['wl3'] = lp['lin3_w'].T.astype(jnp.bfloat16)           # (HID2, 1)
    packed['bl3'] = lp['lin3_b'].reshape(1, 1)
    return packed


def _pick_block(B):
    """Batch rows per grid block: multiple of 8, at most BB_MAX, and small
    enough that the batch splits into >=2 blocks when possible (v7x 2 TCs)."""
    half = -(-B // 2)                                             # ceil(B/2)
    return min(BB_MAX, max(8, _round_up(half, 8)))


@jax.jit
def textcnn_forward(tokens, packed):
    B, L = tokens.shape
    assert L == MAXLEN
    bb = _pick_block(B)
    n_blocks = _round_up(B, bb) // bb
    B_pad = n_blocks * bb

    # Pad sequence (im2col window slack) and batch (to a multiple of bb) with a
    # pad token id that maps to an all-zero embedding row.
    tok_p = jnp.full((B_pad, L_PAD), VOCAB_SIZE, jnp.int32)
    tok_p = tok_p.at[:B, :L].set(tokens.astype(jnp.int32))
    tok_p = tok_p.reshape(B_pad * L_PAD, 1)

    weights = (packed['table'], packed['wconv'], packed['bconv'],
               packed['wl1'], packed['bl1'],
               packed['wl2'], packed['bl2'],
               packed['wl3'], packed['bl3'])

    def const_spec(arr):
        return pl.BlockSpec(arr.shape, lambda i: (0,) * arr.ndim)

    out = pl.pallas_call(
        functools.partial(textcnn_kernel, seq_len=L),
        out_shape=jax.ShapeDtypeStruct((B_pad, 1), jnp.float32),
        grid=(n_blocks,),
        in_specs=[pl.BlockSpec((bb * L_PAD, 1), lambda i: (i, 0))]
                 + [const_spec(w) for w in weights],
        out_specs=pl.BlockSpec((bb, 1), lambda i: (i, 0)),
        compiler_params=pltpu.CompilerParams(
            dimension_semantics=("parallel",)),
    )(tok_p, *weights)
    return out[:B]


def textcnn_reference(tokens, lp):
    """Pure-JAX f32 reference with PyTorch semantics (for a sanity check)."""
    emb = lp['embedding'][tokens]                                 # (B, L, E)
    B, L, _ = emb.shape
    pooled = []
    for k in KERNEL_LIST:
        W, bias = lp[f'conv{k}_w'], lp[f'conv{k}_b']
        Lk = L - k + 1
        conv = jnp.zeros((B, Lk, FILTER_NUM), jnp.float32)
        for i in range(k):
            conv = conv + jnp.einsum('ble,fe->blf', emb[:, i:i + Lk, :], W[:, i, :])
        conv = jnp.maximum(conv + bias[None, None, :], 0.0)
        pooled.append(jnp.max(conv, axis=1))
    feat = jnp.concatenate(pooled, axis=-1)                       # (B, 300)
    h1 = jnp.maximum(feat @ lp['lin1_w'].T + lp['lin1_b'], 0.0)
    h2 = jnp.maximum(h1 @ lp['lin2_w'].T + lp['lin2_b'], 0.0)
    return jax.nn.sigmoid(h2 @ lp['lin3_w'].T + lp['lin3_b'])


if __name__ == "__main__":
    key = jax.random.PRNGKey(0)
    pkey, tkey = jax.random.split(key)
    logical = init_logical_params(pkey)
    packed = pack_params(logical)

    batch = 2
    tokens = jax.random.randint(tkey, (batch, MAXLEN), 0, VOCAB_SIZE, dtype=jnp.int32)

    out = textcnn_forward(tokens, packed)
    out = jax.block_until_ready(out)

    assert out.shape == (batch, 1) and out.dtype == jnp.float32
    assert bool(jnp.all(jnp.isfinite(out)))
    assert bool(jnp.all((out >= 0.0) & (out <= 1.0)))

    ref = textcnn_reference(tokens, logical)
    err = float(jnp.max(jnp.abs(out - ref)))
    assert err < 5e-2, f"kernel/reference mismatch: {err}"
    print("KERNEL_OK")
</pallas_src>

<mosaic_0001>
module attributes {stable_mosaic.version = 11 : i64} {
  func.func @textcnn_kernel(%arg0: i32, %arg1: memref<192x1xi32, #tpu.memory_space<vmem>>, %arg2: memref<128x64xbf16, #tpu.memory_space<vmem>>, %arg3: memref<320x384xbf16, #tpu.memory_space<vmem>>, %arg4: memref<1x384xf32, #tpu.memory_space<vmem>>, %arg5: memref<384x64xbf16, #tpu.memory_space<vmem>>, %arg6: memref<1x64xf32, #tpu.memory_space<vmem>>, %arg7: memref<64x32xbf16, #tpu.memory_space<vmem>>, %arg8: memref<1x32xf32, #tpu.memory_space<vmem>>, %arg9: memref<32x1xbf16, #tpu.memory_space<vmem>>, %arg10: memref<1x1xf32, #tpu.memory_space<vmem>>, %arg11: memref<8x1xf32, #tpu.memory_space<vmem>>) attributes {dimension_semantics = [#tpu.dimension_semantics<parallel>], iteration_bounds = array<i64: 1>, scalar_prefetch = 0 : i64, scratch_operands = 0 : i64, tpu.core_type = #tpu.core_type<tc>, window_params = [{transform_indices = @transform_0, window_bounds = array<i64: 192, 1>}, {pipeline_mode = #tpu.pipeline_mode<synchronous>, transform_indices = @transform_1, window_bounds = array<i64: 128, 64>}, {pipeline_mode = #tpu.pipeline_mode<synchronous>, transform_indices = @transform_2, window_bounds = array<i64: 320, 384>}, {pipeline_mode = #tpu.pipeline_mode<synchronous>, transform_indices = @transform_3, window_bounds = array<i64: 1, 384>}, {pipeline_mode = #tpu.pipeline_mode<synchronous>, transform_indices = @transform_4, window_bounds = array<i64: 384, 64>}, {pipeline_mode = #tpu.pipeline_mode<synchronous>, transform_indices = @transform_5, window_bounds = array<i64: 1, 64>}, {pipeline_mode = #tpu.pipeline_mode<synchronous>, transform_indices = @transform_6, window_bounds = array<i64: 64, 32>}, {pipeline_mode = #tpu.pipeline_mode<synchronous>, transform_indices = @transform_7, window_bounds = array<i64: 1, 32>}, {pipeline_mode = #tpu.pipeline_mode<synchronous>, transform_indices = @transform_8, window_bounds = array<i64: 32, 1>}, {pipeline_mode = #tpu.pipeline_mode<synchronous>, transform_indices = @transform_9, window_bounds = array<i64: 1, 1>}, {transform_indices = @transform_10, window_bounds = array<i64: 8, 1>}]} {
    %c0 = arith.constant 0 : index
    %c0_0 = arith.constant 0 : index
    %0 = vector.load %arg1[%c0, %c0_0] : memref<192x1xi32, #tpu.memory_space<vmem>>, vector<192x1xi32>
    %1 = tpu.iota {dimensions = array<i32: 1>} : vector<192x128xi32>
    %2 = vector.broadcast %0 : vector<192x1xi32> to vector<192x128xi32>
    %3 = arith.cmpi eq, %2, %1 : vector<192x128xi32>
    %4 = arith.extui %3 : vector<192x128xi1> to vector<192x128xi32>
    %5 = arith.sitofp %4 : vector<192x128xi32> to vector<192x128xf32>
    %6 = arith.truncf %5 : vector<192x128xf32> to vector<192x128xbf16>
    %c0_1 = arith.constant 0 : index
    %c0_2 = arith.constant 0 : index
    %7 = vector.load %arg2[%c0_1, %c0_2] : memref<128x64xbf16, #tpu.memory_space<vmem>>, vector<128x64xbf16>
    %cst = arith.constant dense<0.000000e+00> : vector<192x64xf32>
    %8 = tpu.matmul %6, %7, %cst {dimension_numbers = #tpu.dot_dimension_numbers<[1], [0], [0], [1], [0, 0, 1, 1], [], []>} : vector<192x128xbf16>, vector<128x64xbf16>, vector<192x64xf32> -> vector<192x64xf32>
    %9 = arith.truncf %8 : vector<192x64xf32> to vector<192x64xbf16>
    %10 = vector.shape_cast %9 : vector<192x64xbf16> to vector<8x24x64xbf16>
    %11 = vector.extract_strided_slice %10 {offsets = [0, 0, 0], sizes = [8, 16, 64], strides = [1, 1, 1]} : vector<8x24x64xbf16> to vector<8x16x64xbf16>
    %12 = vector.shape_cast %11 : vector<8x16x64xbf16> to vector<128x64xbf16>
    %13 = vector.extract_strided_slice %10 {offsets = [0, 1, 0], sizes = [8, 16, 64], strides = [1, 1, 1]} : vector<8x24x64xbf16> to vector<8x16x64xbf16>
    %14 = vector.shape_cast %13 : vector<8x16x64xbf16> to vector<128x64xbf16>
    %15 = vector.extract_strided_slice %10 {offsets = [0, 2, 0], sizes = [8, 16, 64], strides = [1, 1, 1]} : vector<8x24x64xbf16> to vector<8x16x64xbf16>
    %16 = vector.shape_cast %15 : vector<8x16x64xbf16> to vector<128x64xbf16>
    %17 = vector.extract_strided_slice %10 {offsets = [0, 3, 0], sizes = [8, 16, 64], strides = [1, 1, 1]} : vector<8x24x64xbf16> to vector<8x16x64xbf16>
    %18 = vector.shape_cast %17 : vector<8x16x64xbf16> to vector<128x64xbf16>
    %19 = vector.extract_strided_slice %10 {offsets = [0, 4, 0], sizes = [8, 16, 64], strides = [1, 1, 1]} : vector<8x24x64xbf16> to vector<8x16x64xbf16>
    %20 = vector.shape_cast %19 : vector<8x16x64xbf16> to vector<128x64xbf16>
    %21 = tpu.concatenate %12, %14, %16, %18, %20 in 1 : vector<128x64xbf16>, vector<128x64xbf16>, vector<128x64xbf16>, vector<128x64xbf16>, vector<128x64xbf16> -> vector<128x320xbf16>
    %c0_3 = arith.constant 0 : index
    %c0_4 = arith.constant 0 : index
    %22 = vector.load %arg3[%c0_3, %c0_4] : memref<320x384xbf16, #tpu.memory_space<vmem>>, vector<320x384xbf16>
    %cst_5 = arith.constant dense<0.000000e+00> : vector<128x384xf32>
    %23 = tpu.matmul %21, %22, %cst_5 {dimension_numbers = #tpu.dot_dimension_numbers<[1], [0], [0], [1], [0, 0, 1, 1], [], []>} : vector<128x320xbf16>, vector<320x384xbf16>, vector<128x384xf32> -> vector<128x384xf32>
    %24 = vector.shape_cast %23 : vector<128x384xf32> to vector<8x16x384xf32>
    %25 = tpu.iota {dimensions = array<i32: 1>} : vector<8x16x1xi32>
    %26 = vector.extract_strided_slice %24 {offsets = [0, 0, 0], sizes = [8, 16, 128], strides = [1, 1, 1]} : vector<8x16x384xf32> to vector<8x16x128xf32>
    %c14_i32 = arith.constant 14 : i32
    %27 = vector.broadcast %c14_i32 : i32 to vector<8x16x1xi32>
    %28 = arith.cmpi slt, %25, %27 : vector<8x16x1xi32>
    %cst_6 = arith.constant -1.000000e+30 : f32
    %29 = vector.shape_cast %28 : vector<8x16x1xi1> to vector<8x16x1xi1>
    %30 = vector.broadcast %29 : vector<8x16x1xi1> to vector<8x16x128xi1>
    %31 = vector.broadcast %cst_6 : f32 to vector<8x16x128xf32>
    %32 = arith.select %30, %26, %31 : vector<8x16x128xi1>, vector<8x16x128xf32>
    %cst_7 = arith.constant dense<0xFF800000> : vector<8x128xf32>
    %33 = vector.multi_reduction <maximumf>, %32, %cst_7 [1] : vector<8x16x128xf32> to vector<8x128xf32>
    %34 = vector.extract_strided_slice %24 {offsets = [0, 0, 128], sizes = [8, 16, 128], strides = [1, 1, 1]} : vector<8x16x384xf32> to vector<8x16x128xf32>
    %c13_i32 = arith.constant 13 : i32
    %35 = vector.broadcast %c13_i32 : i32 to vector<8x16x1xi32>
    %36 = arith.cmpi slt, %25, %35 : vector<8x16x1xi32>
    %cst_8 = arith.constant -1.000000e+30 : f32
    %37 = vector.shape_cast %36 : vector<8x16x1xi1> to vector<8x16x1xi1>
    %38 = vector.broadcast %37 : vector<8x16x1xi1> to vector<8x16x128xi1>
    %39 = vector.broadcast %cst_8 : f32 to vector<8x16x128xf32>
    %40 = arith.select %38, %34, %39 : vector<8x16x128xi1>, vector<8x16x128xf32>
    %cst_9 = arith.constant dense<0xFF800000> : vector<8x128xf32>
    %41 = vector.multi_reduction <maximumf>, %40, %cst_9 [1] : vector<8x16x128xf32> to vector<8x128xf32>
    %42 = vector.extract_strided_slice %24 {offsets = [0, 0, 256], sizes = [8, 16, 128], strides = [1, 1, 1]} : vector<8x16x384xf32> to vector<8x16x128xf32>
    %c12_i32 = arith.constant 12 : i32
    %43 = vector.broadcast %c12_i32 : i32 to vector<8x16x1xi32>
    %44 = arith.cmpi slt, %25, %43 : vector<8x16x1xi32>
    %cst_10 = arith.constant -1.000000e+30 : f32
    %45 = vector.shape_cast %44 : vector<8x16x1xi1> to vector<8x16x1xi1>
    %46 = vector.broadcast %45 : vector<8x16x1xi1> to vector<8x16x128xi1>
    %47 = vector.broadcast %cst_10 : f32 to vector<8x16x128xf32>
    %48 = arith.select %46, %42, %47 : vector<8x16x128xi1>, vector<8x16x128xf32>
    %cst_11 = arith.constant dense<0xFF800000> : vector<8x128xf32>
    %49 = vector.multi_reduction <maximumf>, %48, %cst_11 [1] : vector<8x16x128xf32> to vector<8x128xf32>
    %50 = tpu.concatenate %33, %41, %49 in 1 : vector<8x128xf32>, vector<8x128xf32>, vector<8x128xf32> -> vector<8x384xf32>
    %c0_12 = arith.constant 0 : index
    %c0_13 = arith.constant 0 : index
    %51 = vector.load %arg4[%c0_12, %c0_13] : memref<1x384xf32, #tpu.memory_space<vmem>>, vector<1x384xf32>
    %52 = vector.broadcast %51 : vector<1x384xf32> to vector<8x384xf32>
    %53 = arith.addf %50, %52 : vector<8x384xf32>
    %cst_14 = arith.constant 0.000000e+00 : f32
    %54 = vector.broadcast %cst_14 : f32 to vector<8x384xf32>
    %55 = arith.maximumf %53, %54 : vector<8x384xf32>
    %56 = arith.truncf %55 : vector<8x384xf32> to vector<8x384xbf16>
    %c0_15 = arith.constant 0 : index
    %c0_16 = arith.constant 0 : index
    %57 = vector.load %arg5[%c0_15, %c0_16] : memref<384x64xbf16, #tpu.memory_space<vmem>>, vector<384x64xbf16>
    %cst_17 = arith.constant dense<0.000000e+00> : vector<8x64xf32>
    %58 = tpu.matmul %56, %57, %cst_17 {dimension_numbers = #tpu.dot_dimension_numbers<[1], [0], [0], [1], [0, 0, 1, 1], [], []>} : vector<8x384xbf16>, vector<384x64xbf16>, vector<8x64xf32> -> vector<8x64xf32>
    %c0_18 = arith.constant 0 : index
    %c0_19 = arith.constant 0 : index
    %59 = vector.load %arg6[%c0_18, %c0_19] : memref<1x64xf32, #tpu.memory_space<vmem>>, vector<1x64xf32>
    %60 = vector.broadcast %59 : vector<1x64xf32> to vector<8x64xf32>
    %61 = arith.addf %58, %60 : vector<8x64xf32>
    %cst_20 = arith.constant 0.000000e+00 : f32
    %62 = vector.broadcast %cst_20 : f32 to vector<8x64xf32>
    %63 = arith.maximumf %61, %62 : vector<8x64xf32>
    %64 = arith.truncf %63 : vector<8x64xf32> to vector<8x64xbf16>
    %c0_21 = arith.constant 0 : index
    %c0_22 = arith.constant 0 : index
    %65 = vector.load %arg7[%c0_21, %c0_22] : memref<64x32xbf16, #tpu.memory_space<vmem>>, vector<64x32xbf16>
    %cst_23 = arith.constant dense<0.000000e+00> : vector<8x32xf32>
    %66 = tpu.matmul %64, %65, %cst_23 {dimension_numbers = #tpu.dot_dimension_numbers<[1], [0], [0], [1], [0, 0, 1, 1], [], []>} : vector<8x64xbf16>, vector<64x32xbf16>, vector<8x32xf32> -> vector<8x32xf32>
    %c0_24 = arith.constant 0 : index
    %c0_25 = arith.constant 0 : index
    %67 = vector.load %arg8[%c0_24, %c0_25] : memref<1x32xf32, #tpu.memory_space<vmem>>, vector<1x32xf32>
    %68 = vector.broadcast %67 : vector<1x32xf32> to vector<8x32xf32>
    %69 = arith.addf %66, %68 : vector<8x32xf32>
    %cst_26 = arith.constant 0.000000e+00 : f32
    %70 = vector.broadcast %cst_26 : f32 to vector<8x32xf32>
    %71 = arith.maximumf %69, %70 : vector<8x32xf32>
    %72 = arith.truncf %71 : vector<8x32xf32> to vector<8x32xbf16>
    %c0_27 = arith.constant 0 : index
    %c0_28 = arith.constant 0 : index
    %73 = vector.load %arg9[%c0_27, %c0_28] : memref<32x1xbf16, #tpu.memory_space<vmem>>, vector<32x1xbf16>
    %cst_29 = arith.constant dense<0.000000e+00> : vector<8x1xf32>
    %74 = tpu.matmul %72, %73, %cst_29 {dimension_numbers = #tpu.dot_dimension_numbers<[1], [0], [0], [1], [0, 0, 1, 1], [], []>} : vector<8x32xbf16>, vector<32x1xbf16>, vector<8x1xf32> -> vector<8x1xf32>
    %c0_30 = arith.constant 0 : index
    %c0_31 = arith.constant 0 : index
    %75 = vector.load %arg10[%c0_30, %c0_31] : memref<1x1xf32, #tpu.memory_space<vmem>>, vector<1x1xf32>
    %76 = vector.broadcast %75 : vector<1x1xf32> to vector<8x1xf32>
    %77 = arith.addf %74, %76 : vector<8x1xf32>
    %78 = arith.negf %77 : vector<8x1xf32>
    %79 = math.exp %78 : vector<8x1xf32>
    %cst_32 = arith.constant 1.000000e+00 : f32
    %80 = vector.broadcast %cst_32 : f32 to vector<8x1xf32>
    %81 = arith.addf %80, %79 : vector<8x1xf32>
    %82 = arith.divf %80, %81 : vector<8x1xf32>
    %c0_33 = arith.constant 0 : index
    %c0_34 = arith.constant 0 : index
    %83 = vector.load %arg11[%c0_33, %c0_34] : memref<8x1xf32, #tpu.memory_space<vmem>>, vector<8x1xf32>
    tpu.vector_store %arg11[%c0_33, %c0_34], %82 {strides = array<i32>} : memref<8x1xf32, #tpu.memory_space<vmem>>, vector<8x1xf32>,
    return
  }
  func.func @transform_0(%arg0: i32) -> (i32, i32) {
    %c0_i32 = arith.constant 0 : i32
    %c0_i32_0 = arith.constant 0 : i32
    return %arg0, %c0_i32 : i32, i32
  }
  func.func @transform_1(%arg0: i32) -> (i32, i32) {
    %c0_i32 = arith.constant 0 : i32
    %c0_i32_0 = arith.constant 0 : i32
    %c0_i32_1 = arith.constant 0 : i32
    return %c0_i32, %c0_i32_0 : i32, i32
  }
  func.func @transform_2(%arg0: i32) -> (i32, i32) {
    %c0_i32 = arith.constant 0 : i32
    %c0_i32_0 = arith.constant 0 : i32
    %c0_i32_1 = arith.constant 0 : i32
    return %c0_i32, %c0_i32_0 : i32, i32
  }
  func.func @transform_3(%arg0: i32) -> (i32, i32) {
    %c0_i32 = arith.constant 0 : i32
    %c0_i32_0 = arith.constant 0 : i32
    %c0_i32_1 = arith.constant 0 : i32
    return %c0_i32, %c0_i32_0 : i32, i32
  }
  func.func @transform_4(%arg0: i32) -> (i32, i32) {
    %c0_i32 = arith.constant 0 : i32
    %c0_i32_0 = arith.constant 0 : i32
    %c0_i32_1 = arith.constant 0 : i32
    return %c0_i32, %c0_i32_0 : i32, i32
  }
  func.func @transform_5(%arg0: i32) -> (i32, i32) {
    %c0_i32 = arith.constant 0 : i32
    %c0_i32_0 = arith.constant 0 : i32
    %c0_i32_1 = arith.constant 0 : i32
    return %c0_i32, %c0_i32_0 : i32, i32
  }
  func.func @transform_6(%arg0: i32) -> (i32, i32) {
    %c0_i32 = arith.constant 0 : i32
    %c0_i32_0 = arith.constant 0 : i32
    %c0_i32_1 = arith.constant 0 : i32
    return %c0_i32, %c0_i32_0 : i32, i32
  }
  func.func @transform_7(%arg0: i32) -> (i32, i32) {
    %c0_i32 = arith.constant 0 : i32
    %c0_i32_0 = arith.constant 0 : i32
    %c0_i32_1 = arith.constant 0 : i32
    return %c0_i32, %c0_i32_0 : i32, i32
  }
  func.func @transform_8(%arg0: i32) -> (i32, i32) {
    %c0_i32 = arith.constant 0 : i32
    %c0_i32_0 = arith.constant 0 : i32
    %c0_i32_1 = arith.constant 0 : i32
    return %c0_i32, %c0_i32_0 : i32, i32
  }
  func.func @transform_9(%arg0: i32) -> (i32, i32) {
    %c0_i32 = arith.constant 0 : i32
    %c0_i32_0 = arith.constant 0 : i32
    %c0_i32_1 = arith.constant 0 : i32
    return %c0_i32, %c0_i32_0 : i32, i32
  }
  func.func @transform_10(%arg0: i32) -> (i32, i32) {
    %c0_i32 = arith.constant 0 : i32
    %c0_i32_0 = arith.constant 0 : i32
    return %arg0, %c0_i32 : i32, i32
  }
}

</mosaic_0001>

<bundles_post_ra>
// kernel: textcnn_forward.1
= control target key start
LH: loop header
LB: loop body
LE: loop exit
PB: predicated region body
PF: predicated region fallthrough
CT: control target
= control target key end

     0   :  { %v5053_v0 = vmov 0   ;;  %v5050_v33 = vlaneseq  ;;  %v3361_v39 = vmov 1.0|1.0   ;;  %s3362_s27 = smov 64   ;;  %s5039_s0 = inlined_call_operand.vmem [shape: s32[192,1], index: 0, kind: input, shape index: {}]   ;;  %s5040_s1 = inlined_call_operand.vmem [shape: bf16[128,64], index: 1, kind: input, shape index: {}]   ;;  %s5041_s2 = inlined_call_operand.vmem [shape: bf16[320,384], index: 2, kind: input, shape index: {}]   ;;  %s5042_s4 = inlined_call_operand.vmem [shape: bf16[384,64], index: 4, kind: input, shape index: {}]   ;;  %s5043_s3 = inlined_call_operand.vmem [shape: f32[1,384], index: 3, kind: input, shape index: {}]   ;;  %s5044_s6 = inlined_call_operand.vmem [shape: bf16[64,32], index: 6, kind: input, shape index: {}]   ;;  %s5045_s8 = inlined_call_operand.vmem [shape: bf16[32,1], index: 8, kind: input, shape index: {}]   ;;  %s5046_s5 = inlined_call_operand.vmem [shape: f32[1,64], index: 5, kind: input, shape index: {}]   ;;  %s5047_s9 = inlined_call_operand.<no memory space> [shape: f32[1,1], index: 9, kind: input, shape index: {}]   ;;  %s5048_s7 = inlined_call_operand.vmem [shape: f32[1,32], index: 7, kind: input, shape index: {}]   ;;  %s5049_s10 = inlined_call_operand.vmem [shape: f32[8,1], index: 10, kind: output, shape index: {}]  }
   0x1   :  { %3237 = vset.pattern.permute.xlu1 %v5053_v0  ;;  %3236 = vset.pattern.permute.xlu0 %v5053_v0  ;;  %v40_v1 = vld [vmem:[%s5039_s0 + $0x10] sm:$0xff]  ;;  %v38_v2 = vld [vmem:[%s5039_s0] sm:$0xff]  ;;  %v41_v3 = vld [vmem:[%s5039_s0 + $0x18] sm:$0xff] }
   0x2   :  { %71 = vperm.xlu1 %3237, %v40_v1   ;;  %65 = vperm.xlu0 %3236, %v38_v2   ;;  %v39_v4 = vld [vmem:[%s5039_s0 + $0x8] sm:$0xff]  ;;  %v42_v6 = vld [vmem:[%s5039_s0 + $0x20] sm:$0xff]  ;;  %v45_v7 = vld [vmem:[%s5039_s0 + $0x38] sm:$0xff]  ;;  %v3519_v36 = vand.u32 127, %v5050_v33 }
   0x3   :  { %v43_v5 = vld [vmem:[%s5039_s0 + $0x28] sm:$0xff]  ;;  %v3238_v8 = vld [vmem:[%s5040_s1 + $0x38] sm:$0xff]   ;;  %v3239_v9 = vld [vmem:[%s5040_s1 + $0x30] sm:$0xff]  }
   0x4   :  { %v44_v10 = vld [vmem:[%s5039_s0 + $0x30] sm:$0xff]  ;;  %3127 = vmatprep.subr.bf16.mxu0 %v3238_v8  ;;  %v3240_v11 = vld [vmem:[%s5040_s1 + $0x28] sm:$0xff]   ;;  %v46_v13 = vld [vmem:[%s5039_s0 + $0x40] sm:$0xff] }
   0x5   :  { %3128 = vmatpush3.bf16.msra.mxu0 %v3238_v8  ;;  %v47_v12 = vld [vmem:[%s5039_s0 + $0x48] sm:$0xff]  ;;  %v3241_v14 = vld [vmem:[%s5040_s1 + $0x20] sm:$0xff]   ;;  %v49_v15 = vld [vmem:[%s5039_s0 + $0x58] sm:$0xff] }
   0x6   :  { %74 = vperm.xlu1 %3237, %v41_v3   ;;  %68 = vperm.xlu0 %3236, %v39_v4   ;;  %v48_v16 = vld [vmem:[%s5039_s0 + $0x50] sm:$0xff]  ;;  %v3242_v17 = vld [vmem:[%s5040_s1 + $0x18] sm:$0xff]   ;;  %v51_v18 = vld [vmem:[%s5039_s0 + $0x68] sm:$0xff] }
   0x7   :  { %3129 = vmatprep.subr.bf16.mxu0 %v3239_v9  ;;  %v50_v19 = vld [vmem:[%s5039_s0 + $0x60] sm:$0xff]  ;;  %v3243_v20 = vld [vmem:[%s5040_s1 + $0x10] sm:$0xff]   ;;  %v53_v21 = vld [vmem:[%s5039_s0 + $0x78] sm:$0xff] }
   0x8   :  { %v52_v22 = vld [vmem:[%s5039_s0 + $0x70] sm:$0xff]  ;;  %v3244_v23 = vld [vmem:[%s5040_s1 + $0x8] sm:$0xff]   ;;  %v54_v25 = vld [vmem:[%s5039_s0 + $0x80] sm:$0xff] }
   0x9   :  { %3130 = vmatpush3.bf16.msra.mxu0 %v3239_v9  ;;  %v55_v24 = vld [vmem:[%s5039_s0 + $0x88] sm:$0xff]  ;;  %v3245_v26 = vld [vmem:[%s5040_s1] sm:$0xff]   ;;  %v57_v27 = vld [vmem:[%s5039_s0 + $0x98] sm:$0xff] }
   0xa   :  { %80 = vperm.xlu1 %3237, %v43_v5   ;;  %77 = vperm.xlu0 %3236, %v42_v6   ;;  %v56_v28 = vld [vmem:[%s5039_s0 + $0x90] sm:$0xff]  ;;  %v59_v29 = vld [vmem:[%s5039_s0 + $0xa8] sm:$0xff]  ;;  %v58_v30 = vld [vmem:[%s5039_s0 + $0xa0] sm:$0xff] }
   0xb   :  { %3131 = vmatprep.subr.bf16.mxu0 %v3240_v11  ;;  %v61_v31 = vld [vmem:[%s5039_s0 + $0xb8] sm:$0xff]  ;;  %v60_v32 = vld [vmem:[%s5039_s0 + $0xb0] sm:$0xff]  ;;  %v3255_v4 = vld [vmem:[%s5041_s2 + $0x180] ss:$12 sps:$4 sm:$0xff]  }
   0xc   :  { %v3248_v60 = vld [vmem:[%s5041_s2 + $0x1cc] ss:$12 sps:$4 sm:$0xff]   ;;  %v3246_v61 = vld [vmem:[%s5041_s2 + $0x1c8] ss:$12 sps:$4 sm:$0xff]   ;;  %v3249_v63 = vld [vmem:[%s5041_s2 + $0x1b0] ss:$12 sps:$4 sm:$0xff]  }
   0xd   :  { %3132 = vmatpush3.bf16.msra.mxu0 %v3240_v11  ;;  %v3251_v62 = vld [vmem:[%s5041_s2 + $0x1b4] ss:$12 sps:$4 sm:$0xff]   ;;  %v3254_v1 = vld [vmem:[%s5041_s2 + $0x19c] ss:$12 sps:$4 sm:$0xff]   ;;  %v3252_v2 = vld [vmem:[%s5041_s2 + $0x198] ss:$12 sps:$4 sm:$0xff]  }
   0xe   :  { %86 = vperm.xlu1 %3237, %v45_v7   ;;  %83 = vperm.xlu0 %3236, %v44_v10   ;;  %v3257_v3 = vld [vmem:[%s5041_s2 + $0x184] ss:$12 sps:$4 sm:$0xff]   ;;  %v3260_v6 = vld [vmem:[%s5041_s2 + $0xac] ss:$12 sps:$4 sm:$0xff]   ;;  %v3263_v7 = vld [vmem:[%s5041_s2 + $0xa8] ss:$12 sps:$4 sm:$0xff]  }
   0xf   :  { %3133 = vmatprep.subr.bf16.mxu0 %v3241_v14  ;;  %v3573_v5 = vld [vmem:[%s5041_s2 + $0x1d0] ss:$12 sps:$4 sm:$0xff]   ;;  %1546 = vmatprep.subr.bf16.mxu1 %v3260_v6  ;;  %v3264_v8 = vld [vmem:[%s5041_s2 + $0x94] ss:$12 sps:$4 sm:$0xff]   ;;  %v3270_v11 = vld [vmem:[%s5041_s2 + $0x78] ss:$12 sps:$4 sm:$0xff]  }
  0x10   :  { %1547 = vmatpush1.bf16.msra.mxu1 %v3263_v7  ;;  %v3267_v9 = vld [vmem:[%s5041_s2 + $0x90] ss:$12 sps:$4 sm:$0xff]  }
  0x11   :  { %3134 = vmatpush3.bf16.msra.mxu0 %v3241_v14  ;;  %1548 = vmatprep.subr.bf16.mxu1 %v3264_v8  ;;  %v3268_v10 = vld [vmem:[%s5041_s2 + $0x7c] ss:$12 sps:$4 sm:$0xff]   ;;  %v3274_v14 = vld [vmem:[%s5041_s2 + $0x4c] ss:$12 sps:$4 sm:$0xff]  }
  0x12   :  { %92 = vperm.xlu1 %3237, %v47_v12   ;;  %89 = vperm.xlu0 %3236, %v46_v13   ;;  %v3271_v12 = vld [vmem:[%s5041_s2 + $0x64] ss:$12 sps:$4 sm:$0xff]   ;;  %v3273_v13 = vld [vmem:[%s5041_s2 + $0x60] ss:$12 sps:$4 sm:$0xff]  }
  0x13   :  { %3135 = vmatprep.subr.bf16.mxu0 %v3242_v17 }
  0x14   :  { %1549 = vmatpush1.bf16.msra.mxu1 %v3267_v9  ;;  %v3266_v9 = vld [vmem:[%s5041_s2 + $0x188] ss:$12 sps:$4 sm:$0xff]  }
  0x15   :  { %3136 = vmatpush3.bf16.msra.mxu0 %v3242_v17  ;;  %1550 = vmatprep.subr.bf16.mxu1 %v3268_v10 }
  0x16   :  { %98 = vperm.xlu1 %3237, %v49_v15   ;;  %95 = vperm.xlu0 %3236, %v48_v16   ;;  %v3276_v15 = vld [vmem:[%s5041_s2 + $0x48] ss:$12 sps:$4 sm:$0xff]  }
  0x17   :  { %3137 = vmatprep.subr.bf16.mxu0 %v3243_v20  ;;  %v3277_v16 = vld [vmem:[%s5041_s2 + $0x34] ss:$12 sps:$4 sm:$0xff]  }
  0x18   :  { %1551 = vmatpush1.bf16.msra.mxu1 %v3270_v11 }
  0x19   :  { %3138 = vmatpush3.bf16.msra.mxu0 %v3243_v20  ;;  %1552 = vmatprep.subr.bf16.mxu1 %v3271_v12  ;;  %v3280_v20 = vld [vmem:[%s5041_s2 + $0x1c] ss:$12 sps:$4 sm:$0xff]  }
  0x1a   :  { %104 = vperm.xlu1 %3237, %v51_v18   ;;  %101 = vperm.xlu0 %3236, %v50_v19   ;;  %v3279_v18 = vld [vmem:[%s5041_s2 + $0x30] ss:$12 sps:$4 sm:$0xff]  }
  0x1b   :  { %3139 = vmatprep.subr.bf16.mxu0 %v3244_v23 }
  0x1c   :  { %1553 = vmatpush1.bf16.msra.mxu1 %v3273_v13 }
  0x1d   :  { %3140 = vmatpush3.bf16.msra.mxu0 %v3244_v23  ;;  %1554 = vmatprep.subr.bf16.mxu1 %v3274_v14  ;;  %v3288_v14 = vld [vmem:[%s5041_s2 + $0x168] ss:$12 sps:$4 sm:$0xff]  }
  0x1e   :  { %110 = vperm.xlu1 %3237, %v53_v21   ;;  %107 = vperm.xlu0 %3236, %v52_v22  }
  0x1f   :  { %3141 = vmatprep.subr.bf16.mxu0 %v3245_v26 }
  0x20   :  { %1555 = vmatpush1.bf16.msra.mxu1 %v3276_v15 }
  0x21   :  { %3142 = vmatpush3.bf16.msra.mxu0 %v3245_v26  ;;  %1556 = vmatprep.subr.bf16.mxu1 %v3277_v16  ;;  %v3262_v26 = vld [vmem:[%s5041_s2 + $0x1a0] ss:$12 sps:$4 sm:$0xff]  }
  0x22   :  { %116 = vperm.xlu1 %3237, %v55_v24   ;;  %113 = vperm.xlu0 %3236, %v54_v25  }
  0x23   :  { %1667 = vmatprep.subr.bf16.mxu0 %v3248_v60 }
  0x24   :  { %1557 = vmatpush1.bf16.msra.mxu1 %v3279_v18 }
  0x25   :  { %1558 = vmatprep.subr.bf16.mxu1 %v3280_v20  ;;  %v3289_v20 = vld [vmem:[%s5041_s2 + $0x154] ss:$12 sps:$4 sm:$0xff]  }
  0x26   :  { %122 = vperm.xlu1 %3237, %v57_v27   ;;  %119 = vperm.xlu0 %3236, %v56_v28  }
  0x2a   :  { %128 = vperm.xlu1 %3237, %v59_v29   ;;  %125 = vperm.xlu0 %3236, %v58_v30  }
  0x2e   :  { %134 = vperm.xlu1 %3237, %v61_v31   ;;  %131 = vperm.xlu0 %3236, %v60_v32  }
  0x7d   :  { %v72_v34 = vpop.permute.xlu1 %71  ;;  %v66_v35 = vpop.permute.xlu0 %65 }
  0x7e   :  { %vm138_vm0 = vcmp.eq.s32.totalorder %v72_v34, %v3519_v36  ;;  %vm136_vm3 = vcmp.eq.s32.totalorder %v66_v35, %v3519_v36  ;;  %v3282_v35 = vld [vmem:[%s5041_s2 + $0x18] ss:$12 sps:$4 sm:$0xff]  }
  0x7f   :  { %1559 = vmatpush1.bf16.msra.mxu1 %v3282_v35 }
  0x81   :  { %v75_v37 = vpop.permute.xlu1 %74  ;;  %v69_v38 = vpop.permute.xlu0 %68 }
  0x82   :  { %vm139_vm1 = vcmp.eq.s32.totalorder %v75_v37, %v3519_v36  ;;  %vm137_vm2 = vcmp.eq.s32.totalorder %v69_v38, %v3519_v36 }
  0x83   :  { %vm2762_vm4 = vmpackc.low %vm139_vm1, %vm138_vm0 }
  0x84   :  { %vm2760_vm5 = vmpackc.low %vm137_vm2, %vm136_vm3 }
  0x85   :  { %3143 = vmatprep.mubr.msk.bf16.mxu0 %vm2760_vm5, %v3361_v39  ;;  %v81_v40 = vpop.permute.xlu1 %80  ;;  %v78_v41 = vpop.permute.xlu0 %77 }
  0x86   :  { %vm141_vm6 = vcmp.eq.s32.totalorder %v81_v40, %v3519_v36  ;;  %3144 = vmatmul.mubr.msk.bf16.vlgmr.msra.gmra.mxu0 %vm2762_vm4, %v3361_v39  ;;  %vm140_vm7 = vcmp.eq.s32.totalorder %v78_v41, %v3519_v36  ;;  %v3283_v40 = vld [vmem:[%s5041_s2 + $0x4] ss:$12 sps:$4 sm:$0xff]  }
  0x87   :  { %vm2764_vm8 = vmpackc.low %vm141_vm6, %vm140_vm7  ;;  %1668 = vmatpush1.bf16.msra.mxu0 %v3246_v61  ;;  %1560 = vmatprep.subr.bf16.mxu1 %v3283_v40 }
  0x88   :  { %3147 = vmatprep.mubr.msk.bf16.mxu0 %vm2764_vm8, %v3361_v39  ;;  %1669 = vmatprep.subr.bf16.mxu0 %v3251_v62 }
  0x89   :  { %v87_v42 = vpop.permute.xlu1 %86  ;;  %v84_v43 = vpop.permute.xlu0 %83 }
  0x8a   :  { %vm143_vm9 = vcmp.eq.s32.totalorder %v87_v42, %v3519_v36  ;;  %vm142_vm10 = vcmp.eq.s32.totalorder %v84_v43, %v3519_v36 }
  0x8b   :  { %vm2766_vm11 = vmpackc.low %vm143_vm9, %vm142_vm10  ;;  %1670 = vmatpush1.bf16.msra.mxu0 %v3249_v63 }
  0x8c   :  { %1671 = vmatprep.subr.bf16.mxu0 %v3254_v1 }
  0x8d   :  { %v93_v44 = vpop.permute.xlu1 %92  ;;  %v90_v45 = vpop.permute.xlu0 %89 }
  0x8e   :  { %vm145_vm12 = vcmp.eq.s32.totalorder %v93_v44, %v3519_v36  ;;  %3148 = vmatmul.mubr.msk.bf16.gmra.mxu0 %vm2766_vm11, %v3361_v39  ;;  %vm144_vm13 = vcmp.eq.s32.totalorder %v90_v45, %v3519_v36 }
  0x8f   :  { %vm2768_vm14 = vmpackc.low %vm145_vm12, %vm144_vm13  ;;  %1672 = vmatpush1.bf16.msra.mxu0 %v3252_v2 }
  0x90   :  { %3151 = vmatprep.mubr.msk.bf16.mxu0 %vm2768_vm14, %v3361_v39  ;;  %1673 = vmatprep.subr.bf16.mxu0 %v3257_v3 }
  0x91   :  { %v99_v46 = vpop.permute.xlu1 %98  ;;  %v96_v47 = vpop.permute.xlu0 %95 }
  0x92   :  { %vm147_vm15 = vcmp.eq.s32.totalorder %v99_v46, %v3519_v36  ;;  %vm146_vm0 = vcmp.eq.s32.totalorder %v96_v47, %v3519_v36  ;;  %v3285_v46 = vld [vmem:[%s5041_s2] ss:$12 sps:$4 sm:$0xff]  }
  0x93   :  { %vm2770_vm1 = vmpackc.low %vm147_vm15, %vm146_vm0  ;;  %1674 = vmatpush1.bf16.msra.mxu0 %v3255_v4  ;;  %1561 = vmatpush1.bf16.msra.mxu1 %v3285_v46 }
  0x94   :  { %3167 = vmatprep.subr.bf16.mxu0 %v3573_v5 }
  0x95   :  { %v105_v48 = vpop.permute.xlu1 %104  ;;  %v102_v49 = vpop.permute.xlu0 %101 }
  0x96   :  { %vm149_vm2 = vcmp.eq.s32.totalorder %v105_v48, %v3519_v36  ;;  %3152 = vmatmul.mubr.msk.bf16.gmra.mxu0 %vm2770_vm1, %v3361_v39  ;;  %vm148_vm3 = vcmp.eq.s32.totalorder %v102_v49, %v3519_v36 }
  0x97   :  { %vm2772_vm4 = vmpackc.low %vm149_vm2, %vm148_vm3 }
  0x98   :  { %3155 = vmatprep.mubr.msk.bf16.mxu0 %vm2772_vm4, %v3361_v39  ;;  %vm862_vm4 = vcmask 1041408  }
  0x99   :  { %v111_v50 = vpop.permute.xlu1 %110  ;;  %v108_v51 = vpop.permute.xlu0 %107 }
  0x9a   :  { %vm151_vm5 = vcmp.eq.s32.totalorder %v111_v50, %v3519_v36  ;;  %vm150_vm6 = vcmp.eq.s32.totalorder %v108_v51, %v3519_v36  ;;  %v3286_v51 = vld [vmem:[%s5041_s2 + $0x16c] ss:$12 sps:$4 sm:$0xff]  }
  0x9b   :  { %vm2774_vm7 = vmpackc.low %vm151_vm5, %vm150_vm6  ;;  %vm863_vm5 = vcmask 1045508   ;;  %vm1057_vm6 = vcmask 523264   ;;  %1562 = vmatprep.subr.bf16.mxu1 %v3286_v51 }
  0x9c   :  { %1563 = vmatpush2.bf16.msra.mxu1 %v3288_v14  ;;  %v3292_v14 = vld [vmem:[%s5041_s2 + $0x13c] ss:$12 sps:$4 sm:$0xff]  }
  0x9d   :  { %v117_v52 = vpop.permute.xlu1 %116  ;;  %v114_v53 = vpop.permute.xlu0 %113  ;;  %1564 = vmatprep.subr.bf16.mxu1 %v3289_v20 }
  0x9e   :  { %vm153_vm8 = vcmp.eq.s32.totalorder %v117_v52, %v3519_v36  ;;  %3156 = vmatmul.mubr.msk.bf16.gmra.mxu0 %vm2774_vm7, %v3361_v39  ;;  %vm152_vm9 = vcmp.eq.s32.totalorder %v114_v53, %v3519_v36  ;;  %vm3692_vm7 = vmor %vm862_vm4, %vm863_vm5  ;;  %vm2211_vm4 = vcmask 1041409   ;;  %vm2213_vm5 = vcmask 1042434  }
  0x9f   :  { %vm2776_vm10 = vmpackc.low %vm153_vm8, %vm152_vm9  ;;  %vm739_vm8 = vsmask.f32 2304  ;;  %vm740_vm9 = vsmask.f32 6416 }
  0xa0   :  { %3159 = vmatprep.mubr.msk.bf16.mxu0 %vm2776_vm10, %v3361_v39  ;;  %vm485_vm10 = vsmask.f32 3328 }
  0xa1   :  { %v123_v54 = vpop.permute.xlu1 %122  ;;  %v120_v55 = vpop.permute.xlu0 %119 }
  0xa2   :  { %vm155_vm11 = vcmp.eq.s32.totalorder %v123_v54, %v3519_v36  ;;  %vm154_vm12 = vcmp.eq.s32.totalorder %v120_v55, %v3519_v36 }
  0xa3   :  { %vm2778_vm13 = vmpackc.low %vm155_vm11, %vm154_vm12  ;;  %vm486_vm11 = vsmask.f32 7440 }
  0xa4   :  { %vm3831_vm12 = vmor %vm739_vm8, %vm740_vm9  ;;  %vm2217_vm8 = vcmask 1044484   ;;  %vm2219_vm9 = vcmask 1045509  }
  0xa5   :  { %v129_v56 = vpop.permute.xlu1 %128  ;;  %v126_v57 = vpop.permute.xlu0 %125 }
  0xa6   :  { %vm157_vm14 = vcmp.eq.s32.totalorder %v129_v56, %v3519_v36  ;;  %3160 = vmatmul.mubr.msk.bf16.gmra.mxu0 %vm2778_vm13, %v3361_v39  ;;  %vm156_vm15 = vcmp.eq.s32.totalorder %v126_v57, %v3519_v36  ;;  %vm3851_vm13 = vmor %vm485_vm10, %vm486_vm11  ;;  %vm2221_vm10 = vcmask 1046534   ;;  %vm2223_vm11 = vcmask 1047559  }
  0xa7   :  { %vm2780_vm0 = vmpackc.low %vm157_vm14, %vm156_vm15  ;;  %vm680_vm14 = vcmask 1042432   ;;  %vm681_vm15 = vcmask 1046532  }
  0xa8   :  { %3163 = vmatprep.mubr.msk.bf16.mxu0 %vm2780_vm0, %v3361_v39  ;;  %vm4372_vm0 = vmor %vm680_vm14, %vm681_vm15 }
  0xa9   :  { %v135_v58 = vpop.permute.xlu1 %134  ;;  %v132_v59 = vpop.permute.xlu0 %131 }
  0xaa   :  { %vm159_vm1 = vcmp.eq.s32.totalorder %v135_v58, %v3519_v36  ;;  %vm158_vm2 = vcmp.eq.s32.totalorder %v132_v59, %v3519_v36 }
  0xab   :  { %vm2782_vm3 = vmpackc.low %vm159_vm1, %vm158_vm2  ;;  %vm3364_vm2 = vmmov 0  }
  0xae   :  { %3164 = vmatmul.mubr.msk.bf16.gmra.mxu0 %vm2782_vm3, %v3361_v39 }
  0xaf   :  { %1691 = vmatprep.mubr.bf16.mxu0 %v5053_v0 }
 0x146   :  { %v3145_v17 = vpop.f32.mrf.mxu0 }
 0x147   :  { %v3612_v19 = vpack.c.bf16 %v3145_v17, %v3145_v17 }
 0x148   :  { %v3617_v21 = vpop.f32.mrf.mxu0 }
 0x149   :  { %5085 = vst [vmem:[#allocation3_spill] sm:$0xff] %v3617_v21  ;;  %v508_v22 = vshll.u32 %v3612_v19, 16  ;;  %v751_v23 = vshrl.u32 %v3612_v19, 16  ;;  %v3623_v24 = vpack.c.bf16 %v3617_v21, %v3617_v21  ;;  %v870_v30 = vrot.slane %v3612_v19, 6 }
 0x14a   :  { %v3146_v25 = vpop.f32.mrf.mxu0 }
 0x14b   :  { %v414_v27 = vpack.c.bf16 %v3146_v25, %v3145_v17  ;;  %v3626_v28 = vpack.c.bf16 %v3146_v25, %v3146_v25  ;;  %v3628_v29 = vrot.slane %v751_v23, 5  ;;  %v489_v31 = vshrl.u32 %v3623_v24, 16 }
 0x14c   :  { %v492_v32 = vshll.u32 %v3623_v24, 16  ;;  %v3633_v34 = vpop.f32.mrf.mxu0  ;;  %v3643_v39 = vrot.slane %v508_v22, 6  ;;  %v2816_v43 = vrot.slane %v3623_v24, 10 }
 0x14d   :  { %5086 = vst [vmem:[#allocation4_spill] sm:$0xff] %v3633_v34  ;;  %v513_v37 = vshrl.u32 %v3626_v28, 16  ;;  %v516_v38 = vshll.u32 %v3626_v28, 16  ;;  %v3648_v41 = vrot.slane %v489_v31, 5  ;;  %v3653_v44 = vunpack.c.h.b16 %v414_v27 }
 0x14e   :  { %v3650_v42 = vrot.slane %v492_v32, 6  ;;  %v3655_v45 = vpop.f32.mrf.mxu0  ;;  %v3660_v47 = vrot.slane %v489_v31, 4  ;;  %v3662_v48 = vrot.slane %v492_v32, 5  ;;  %v3676_v54 = vpack.c.bf16 %v3633_v34, %v3633_v34 }
 0x14f   :  { %5087 = vst [vmem:[#allocation5_spill] sm:$0xff] %v3653_v44  ;;  %5088 = vst [vmem:[#allocation6_spill] sm:$0xff] %v3655_v45  ;;  %v3664_v49 = vrot.slane %v513_v37, 4  ;;  %v3670_v52 = vrot.slane %v516_v38, 5  ;;  %v3680_v55 = vpack.c.bf16 %v3655_v45, %v3655_v45  ;;  %v3682_v57 = vrot.slane %v513_v37, 5 }
 0x150   :  { %v334_v56 = vpop.f32.mrf.mxu0  ;;  %v3684_v58 = vrot.slane %v516_v38, 6  ;;  %v502_v61 = vshrl.u32 %v3676_v54, 16  ;;  %v867_v63 = vrot.slane %v3676_v54, 6  ;;  %v744_v2 = vor.u32 %v3650_v42, %v3648_v41 }
 0x151   :  { %v3687_v60 = vpack.c.bf16 %v334_v56, %v334_v56  ;;  %v755_v3 = vor.u32 %v3643_v39, %v3628_v29  ;;  %v498_v4 = vshll.u32 %v3676_v54, 16  ;;  %v537_v6 = vshrl.u32 %v3680_v55, 16 }
 0x152   :  { %v3697_v1 = vpop.f32.mrf.mxu0  ;;  %v540_v7 = vshll.u32 %v3680_v55, 16  ;;  %v495_v8 = vor.u32 %v3662_v48, %v3660_v47  ;;  %v869_v10 = vrot.slane %v867_v63, 4  ;;  %v3716_v15 = vrot.slane %v502_v61, 4  ;;  %v3298_v47 = vld [vmem:[%s5041_s2 + $0x10c] ss:$12 sps:$4 sm:$0xff]  }
 0x153   :  { %5091 = vst [vmem:[#allocation7_spill] sm:$0xff] %v3697_v1  ;;  %v868_v16 = vsel %vm3692_vm7, %v2816_v43, %v867_v63  ;;  %v3720_v17 = vrot.slane %v537_v6, 4  ;;  %v522_v18 = vshll.u32 %v3687_v60, 16  ;;  %v5055_v27 = vshrl.u32 %v3687_v60, 16  ;;  %v3291_v43 = vld [vmem:[%s5041_s2 + $0x150] ss:$12 sps:$4 sm:$0xff]  }
 0x154   :  { %v337_v13 = vpop.f32.mrf.mxu0  ;;  %v871_v23 = vsel %vm3692_vm7, %v869_v10, %v870_v30  ;;  %v3728_v25 = vrot.slane %v540_v7, 5  ;;  %v5057_v31 = vrot.slane %v3687_v60, 6  ;;  %v3740_v38 = vpack.c.bf16 %v3697_v1, %v3697_v1  ;;  %v3259_v30 = vld [vmem:[%s5041_s2 + $0x1b8] ss:$12 sps:$4 sm:$0xff]   ;;  %1565 = vmatpush2.bf16.msra.mxu1 %v3291_v43 }
 0x155   :  { %v3734_v35 = vcombine.low %v868_v16, %v871_v23  ;;  %v415_v40 = vpack.c.bf16 %v337_v13, %v334_v56  ;;  %v3748_v46 = vrot.slane %v537_v6, 5  ;;  %v3750_v51 = vrot.slane %v540_v7, 6  ;;  %1566 = vmatprep.subr.bf16.mxu1 %v3292_v14  ;;  %v3295_v43 = vld [vmem:[%s5041_s2 + $0x124] ss:$12 sps:$4 sm:$0xff]   ;;  %v3297_v14 = vld [vmem:[%s5041_s2 + $0x120] ss:$12 sps:$4 sm:$0xff]  }
 0x156   :  { %v3732_v32 = vpop.f32.mrf.mxu0  ;;  %v3752_v63 = vpack.c.bf16 %v337_v13, %v337_v13  ;;  %v3765_v16 = vrot.slane %v5055_v27, 4  ;;  %v5051_v7 = vshrl.u32 %v3740_v38, 16  ;;  %v5052_v13 = vrot.slane %v3740_v38, 6 }
 0x157   :  { %5092 = vst [vmem:[#allocation8_spill] sm:$0xff] %v3734_v35  ;;  %v3756_v10 = vpack.c.bf16 %v3732_v32, %v3732_v32  ;;  %2916 = vmatmul.mubr.msk.bf16.vlgmr.msra.gmra.mxu0 %vm1057_vm6, %v3734_v35  ;;  %v3774_v20 = vrot.slane %v5057_v31, 4  ;;  %v3777_v33 = vunpack.c.l.b16 %v415_v40  ;;  %v747_v27 = vrot.slane %v498_v4, 6 }
 0x158   :  { %5093 = vst [vmem:[#allocation9_spill] sm:$0xff] %v3752_v63  ;;  %v3758_v56 = vpop.f32.mrf.mxu0  ;;  %v766_v37 = vshrl.u32 %v3752_v63, 16  ;;  %1701 = vmatprep.mubr.bf16.mxu0 %v5053_v0  ;;  %3168 = vmatpush3.bf16.msra.mxu0 %v3573_v5  ;;  %v3787_v11 = vrot.slane %v5051_v7, 4  ;;  %v3294_v5 = vld [vmem:[%s5041_s2 + $0x138] ss:$12 sps:$4 sm:$0xff]   ;;  %v3797_v36 = vrot.slane %v5052_v13, 4 }
 0x159   :  { %5094 = vst [vmem:[#allocation10_spill] sm:$0xff] %v3777_v33  ;;  %3169 = vmatprep.subr.bf16.mxu0 %v3259_v30  ;;  %v5056_v50 = vshrl.u32 %v3756_v10, 16  ;;  %v5058_v7 = vrot.slane %v3756_v10, 6  ;;  %v3810_v13 = vpack.c.bf16 %v3758_v56, %v3758_v56  ;;  %v746_v0 = vrot.slane %v502_v61, 5  ;;  %1567 = vmatpush2.bf16.msra.mxu1 %v3294_v5 }
 0x15a   :  { %v3154_v53 = vpop.f32.mrf.mxu0  ;;  %v3814_v12 = vrot.slane %v766_v37, 5  ;;  %v500_v6 = vrot.slane %v498_v4, 5  ;;  %v745_v4 = vrot.slane %v744_v2, 4  ;;  %1568 = vmatprep.subr.bf16.mxu1 %v3295_v43 }
 0x15b   :  { %5095 = vst [vmem:[#allocation11_spill] sm:$0xff] %v3810_v13  ;;  %v3826_v59 = vrot.slane %v5056_v50, 4  ;;  %v781_v61 = vshrl.u32 %v3810_v13, 16  ;;  %v3846_v50 = vrot.slane %v5058_v7, 4  ;;  %v748_v40 = vor.u32 %v747_v27, %v746_v0 }
 0x15c   :  { %v353_v23 = vpop.f32.mrf.mxu0  ;;  %3170 = vmatpush3.bf16.msra.mxu0 %v3259_v30  ;;  %v496_v30 = vrot.slane %v495_v8, 4  ;;  %v505_v42 = vor.u32 %v3716_v15, %v500_v6  ;;  %v418_v8 = vpack.c.bf16 %v3154_v53, %v3732_v32  ;;  %v3862_v0 = vpack.c.bf16 %v3154_v53, %v3154_v53 }
 0x15d   :  { %3171 = vmatprep.subr.bf16.mxu0 %v3262_v26  ;;  %v750_v5 = vrot.slane %v748_v40, 4  ;;  %v510_v15 = vrot.slane %v508_v22, 5  ;;  %v417_v43 = vpack.c.bf16 %v353_v23, %v3758_v56  ;;  %v3869_v31 = vrot.slane %v781_v61, 5  ;;  %1569 = vmatpush2.bf16.msra.mxu1 %v3297_v14 }
 0x15e   :  { %5100 = vst [vmem:[#allocation12_spill] sm:$0xff] %v3862_v0  ;;  %v3864_v27 = vpop.f32.mrf.mxu0  ;;  %v506_v7 = vrot.slane %v505_v42, 4  ;;  %v749_v48 = vsel %vm3831_vm12, %v745_v4, %v748_v40  ;;  %v501_v32 = vsel %vm3851_vm13, %v496_v30, %v500_v6  ;;  %v796_v53 = vshrl.u32 %v3862_v0, 16  ;;  %1570 = vmatprep.subr.bf16.mxu1 %v3298_v47  ;;  %v3300_v6 = vld [vmem:[%s5041_s2 + $0x108] ss:$12 sps:$4 sm:$0xff]  }
 0x15f   :  { %v756_v22 = vsel %vm3831_vm12, %v750_v5, %v755_v3  ;;  %v3883_v56 = vunpack.c.l.b16 %v418_v8  ;;  %v3885_v61 = vunpack.c.h.b16 %v417_v43  ;;  %v3891_v29 = vpack.c.bf16 %v353_v23, %v353_v23  ;;  %v3301_v3 = vld [vmem:[%s5041_s2 + $0xf4] ss:$12 sps:$4 sm:$0xff]   ;;  %v5203_v62 = vld [vmem:[#allocation8_spill] sm:$0xff] }
 0x160   :  { %3172 = vmatpush3.bf16.msra.mxu0 %v3262_v26  ;;  %v511_v26 = vsel %vm3851_vm13, %v506_v7, %v510_v15  ;;  %v2840_v40 = vcombine.low %v749_v48, %v756_v22  ;;  %v3893_v39 = vpop.f32.mrf.mxu0  ;;  %v519_v42 = vor.u32 %v3670_v52, %v3664_v49  ;;  %v524_v47 = vrot.slane %v522_v18, 5 }
 0x161   :  { %3173 = vmatprep.subr.bf16.mxu0 %v3266_v9  ;;  %5101 = vst [vmem:[#allocation13_spill] sm:$0xff] %v3883_v56  ;;  %5102 = vst [vmem:[#allocation14_spill] sm:$0xff] %v3885_v61  ;;  %v2824_v14 = vcombine.low %v501_v32, %v511_v26  ;;  %v3907_v23 = vrot.slane %v796_v53, 5  ;;  %v561_v8 = vshrl.u32 %v3891_v29, 16  ;;  %v564_v5 = vshll.u32 %v3891_v29, 16  ;;  %1571 = vmatpush2.bf16.msra.mxu1 %v3300_v6 }
 0x162   :  { %5103 = vst [vmem:[#allocation15_spill] sm:$0xff] %v3893_v39  ;;  %1017 = vrot.lane.b32.xlu0 %v2840_v40, %s3362_s27  ;;  %v529_v49 = vor.u32 %v3765_v16, %v524_v47  ;;  %v5104_v52 = vshll.u32 %v3752_v63, 16  ;;  %v3918_v43 = vpack.c.bf16 %v3864_v27, %v3864_v27  ;;  %v3303_v32 = vld [vmem:[%s5041_s2 + $0xf0] ss:$12 sps:$4 sm:$0xff]   ;;  %v520_v26 = vrot.slane %v519_v42, 4  ;;  %1572 = vmatprep.subr.bf16.mxu1 %v3301_v3 }
 0x163   :  { %953 = vrot.lane.b32.xlu1 %v2824_v14, %s3362_s27  ;;  %v3923_v53 = vrot.slane %v561_v8, 4  ;;  %v5105_v40 = vrot.slane %v3687_v60, 6  ;;  %v5106_v16 = vrot.slane %v3626_v28, 10  ;;  %v3304_v6 = vld [vmem:[%s5041_s2 + $0xdc] ss:$12 sps:$4 sm:$0xff]   ;;  %v3937_v30 = vrot.slane %v564_v5, 5 }
 0x164   :  { %3174 = vmatpush3.bf16.msra.mxu0 %v3266_v9  ;;  %v534_v9 = vrot.slane %v5104_v52, 5  ;;  %v3932_v52 = vpop.f32.mrf.mxu0  ;;  %v3939_v7 = vrot.slane %v561_v8, 5  ;;  %v3941_v15 = vrot.slane %v564_v5, 6  ;;  %v530_v42 = vrot.slane %v529_v49, 4 }
 0x165   :  { %v875_v14 = vsel %vm3692_vm7, %v5106_v16, %v5105_v40  ;;  %v525_v48 = vsel %vm3851_vm13, %v520_v26, %v524_v47  ;;  %v5107_v40 = vrot.slane %v3752_v63, 6  ;;  %v759_v16 = vor.u32 %v3684_v58, %v3682_v57  ;;  %1573 = vmatpush2.bf16.msra.mxu1 %v3303_v32  ;;  %v3306_v26 = vld [vmem:[%s5041_s2 + $0xd8] ss:$12 sps:$4 sm:$0xff]  }
 0x166   :  { %v535_v8 = vsel %vm3851_vm13, %v530_v42, %v534_v9  ;;  %v5109_v49 = vshrl.u32 %v3687_v60, 16  ;;  %v762_v47 = vrot.slane %v522_v18, 6  ;;  %v811_v57 = vshrl.u32 %v3918_v43, 16  ;;  %1574 = vmatprep.subr.bf16.mxu1 %v3304_v6  ;;  %v3307_v18 = vld [vmem:[%s5041_s2 + $0xc4] ss:$12 sps:$4 sm:$0xff]  }
 0x167   :  { %v878_v3 = vsel %vm3692_vm7, %v3774_v20, %v5107_v40  ;;  %v2825_v20 = vcombine.low %v525_v48, %v535_v8  ;;  %v5110_v58 = vshll.u32 %v3752_v63, 16  ;;  %v3977_v48 = vpack.c.bf16 %v3893_v39, %v3893_v39 }
 0x168   :  { %v3955_v5 = vcombine.low %v875_v14, %v878_v3  ;;  %v761_v4 = vrot.slane %v5109_v49, 5  ;;  %v3968_v14 = vpop.f32.mrf.mxu0  ;;  %v543_v42 = vor.u32 %v3728_v25, %v3720_v17  ;;  %v5112_v3 = vshll.u32 %v3740_v38, 16 }
 0x169   :  { %v769_v9 = vrot.slane %v5110_v58, 6  ;;  %5111 = vst [vmem:[#allocation17_spill] sm:$0xff] %v3968_v14  ;;  %955 = vrot.lane.b32.xlu1 %v2825_v20, %s3362_s27  ;;  %v760_v49 = vrot.slane %v759_v16, 4  ;;  %v585_v22 = vshrl.u32 %v3977_v48, 16  ;;  %v588_v17 = vshll.u32 %v3977_v48, 16  ;;  %1575 = vmatpush2.bf16.msra.mxu1 %v3306_v26 }
 0x16a   :  { %5108 = vst [vmem:[#allocation16_spill] sm:$0xff] %v3955_v5  ;;  %2917 = vmatmul.mubr.msk.bf16.gmra.mxu0 %vm1057_vm6, %v3955_v5  ;;  %v763_v32 = vor.u32 %v762_v47, %v761_v4  ;;  %v548_v8 = vrot.slane %v5112_v3, 5  ;;  %v420_v4 = vpack.c.bf16 %v3932_v52, %v3864_v27  ;;  %v5113_v47 = vmov 0   ;;  %v3309_v16 = vld [vmem:[%s5041_s2 + $0xc0] ss:$12 sps:$4 sm:$0xff]   ;;  %v4003_v6 = vpop.f32.mrf.mxu0  ;;  %1576 = vmatprep.subr.bf16.mxu1 %v3307_v18 }
 0x16b   :  { %v770_v58 = vor.u32 %v769_v9, %v3814_v12  ;;  %1711 = vmatprep.mubr.bf16.mxu0 %v5113_v47  ;;  %v3993_v25 = vpack.c.bf16 %v3932_v52, %v3932_v52  ;;  %v3998_v12 = vrot.slane %v811_v57, 5  ;;  %v544_v20 = vrot.slane %v543_v42, 4  ;;  %5115 = vst [vmem:[#allocation18_spill] sm:$0xff] %v4003_v6  ;;  %v3310_v52 = vld [vmem:[%s5041_s2 + $0x170] ss:$12 sps:$4 sm:$0xff]  }
 0x16c   :  { %v765_v40 = vrot.slane %v763_v32, 4  ;;  %v553_v27 = vor.u32 %v3787_v11, %v548_v8  ;;  %v5114_v9 = vshll.u32 %v3810_v13, 16  ;;  %v764_v26 = vsel %vm3831_vm12, %v760_v49, %v763_v32 }
 0x16d   :  { %v4014_v61 = vrot.slane %v585_v22, 4  ;;  %v4018_v56 = vrot.slane %v585_v22, 5  ;;  %v4020_v45 = vrot.slane %v588_v17, 6  ;;  %v609_v1 = vshrl.u32 %v3993_v25, 16  ;;  %1577 = vmatpush2.bf16.msra.mxu1 %v3309_v16 }
 0x16e   :  { %v558_v3 = vrot.slane %v5114_v9, 5  ;;  %v771_v57 = vsel %vm3831_vm12, %v765_v40, %v770_v58  ;;  %v4016_v9 = vrot.slane %v588_v17, 5  ;;  %v554_v18 = vrot.slane %v553_v27, 4  ;;  %v4033_v27 = vpop.f32.mrf.mxu0  ;;  %3012 = vmatprep.subr.bf16.mxu1 %v3310_v52 }
 0x16f   :  { %v2841_v2 = vcombine.low %v764_v26, %v771_v57  ;;  %v612_v32 = vshll.u32 %v3993_v25, 16  ;;  %v549_v40 = vsel %vm3851_vm13, %v544_v20, %v548_v8  ;;  %v774_v58 = vor.u32 %v3750_v51, %v3748_v46 }
 0x170   :  { %v559_v49 = vsel %vm3851_vm13, %v554_v18, %v558_v3  ;;  %v5116_v22 = vshrl.u32 %v3740_v38, 16  ;;  %v4035_v57 = vunpack.c.h.b16 %v420_v4  ;;  %v4039_v8 = vrot.slane %v609_v1, 4 }
 0x171   :  { %1019 = vrot.lane.b32.xlu0 %v2841_v2, %s3362_s27  ;;  %v2826_v26 = vcombine.low %v549_v40, %v559_v49  ;;  %v4041_v20 = vrot.slane %v612_v32, 5  ;;  %v5118_v3 = vshll.u32 %v3740_v38, 16  ;;  %v5119_v51 = vshll.u32 %v3810_v13, 16 }
 0x172   :  { %v776_v17 = vrot.slane %v5116_v22, 5  ;;  %5117 = vst [vmem:[#allocation19_spill] sm:$0xff] %v4035_v57  ;;  %v4048_v52 = vrot.slane %v609_v1, 5  ;;  %v4054_v40 = vpack.c.bf16 %v3968_v14, %v3968_v14  ;;  %v4058_v49 = vpack.c.bf16 %v4003_v6, %v4003_v6 }
 0x173   :  { %v777_v46 = vrot.slane %v5118_v3, 6  ;;  %v784_v18 = vrot.slane %v5119_v51, 6  ;;  %957 = vrot.lane.b32.xlu1 %v2826_v26, %s3362_s27  ;;  %v4060_v22 = vrot.slane %v612_v32, 6  ;;  %v775_v3 = vrot.slane %v774_v58, 4  ;;  %v4063_v26 = vpop.f32.mrf.mxu0 }
 0x174   :  { %5120 = vst [vmem:[#allocation20_spill] sm:$0xff] %v4063_v26  ;;  %v5068_v1 = vshrl.u32 %v4054_v40, 16  ;;  %v5121_v42 = vrot.slane %v3740_v38, 6  ;;  %v5122_v16 = vrot.slane %v3680_v55, 10  ;;  %v5123_v32 = vrot.slane %v3810_v13, 6 }
 0x175   :  { %v778_v2 = vor.u32 %v777_v46, %v776_v17  ;;  %v785_v51 = vor.u32 %v784_v18, %v3869_v31  ;;  %v633_v17 = vshrl.u32 %v4058_v49, 16  ;;  %v636_v46 = vshll.u32 %v4058_v49, 16 }
 0x176   :  { %v882_v11 = vsel %vm3692_vm7, %v5122_v16, %v5121_v42  ;;  %v885_v58 = vsel %vm3692_vm7, %v3797_v36, %v5123_v32  ;;  %v4082_v18 = vpack.c.bf16 %v4033_v27, %v4033_v27  ;;  %v4089_v16 = vrot.slane %v5068_v1, 4 }
 0x177   :  { %v780_v31 = vrot.slane %v778_v2, 4  ;;  %v779_v4 = vsel %vm3831_vm12, %v775_v3, %v778_v2  ;;  %v5124_v39 = vrot.slane %v4054_v40, 6  ;;  %v385_v2 = vpop.f32.mrf.mxu0  ;;  %v4100_v42 = vrot.slane %v633_v17, 4 }
 0x178   :  { %v4102_v21 = vrot.slane %v636_v46, 5  ;;  %v4104_v1 = vcombine.low %v882_v11, %v885_v58  ;;  %v4106_v36 = vrot.slane %v633_v17, 5  ;;  %v4108_v34 = vrot.slane %v636_v46, 6 }
 0x179   :  { %v786_v32 = vsel %vm3831_vm12, %v780_v31, %v785_v51  ;;  %v4096_v14 = vrot.slane %v5124_v39, 4  ;;  %v789_v39 = vor.u32 %v3941_v15, %v3939_v7  ;;  %v5127_v11 = vshll.u32 %v3756_v10, 16 }
 0x17a   :  { %v2842_v3 = vcombine.low %v779_v4, %v786_v32  ;;  %5125 = vst [vmem:[#allocation21_spill] sm:$0xff] %v4104_v1  ;;  %2918 = vmatmul.mubr.msk.bf16.gmra.mxu0 %vm1057_vm6, %v4104_v1  ;;  %v5126_v4 = vshrl.u32 %v3756_v10, 16  ;;  %v5128_v17 = vshll.u32 %v3862_v0, 16  ;;  %v567_v32 = vor.u32 %v3937_v30, %v3923_v53 }
 0x17b   :  { %v792_v58 = vrot.slane %v5127_v11, 6  ;;  %v5072_v44 = vshrl.u32 %v4082_v18, 16  ;;  %v790_v15 = vrot.slane %v789_v39, 4  ;;  %1721 = vmatprep.mubr.bf16.mxu0 %v5113_v47  ;;  %v4139_v39 = vpack.c.bf16 %v4063_v26, %v4063_v26 }
 0x17c   :  { %1021 = vrot.lane.b32.xlu0 %v2842_v3, %s3362_s27  ;;  %v791_v31 = vrot.slane %v5126_v4, 5  ;;  %v799_v46 = vrot.slane %v5128_v17, 6  ;;  %v5129_v3 = vmov %v5127_v11  ;;  %v4129_v4 = vpop.f32.mrf.mxu0  ;;  %v568_v1 = vrot.slane %v567_v32, 4 }
 0x17d   :  { %v572_v33 = vrot.slane %v5129_v3, 5  ;;  %v582_v5 = vrot.slane %v5128_v17, 5  ;;  %v421_v3 = vpack.c.bf16 %v385_v2, %v4033_v27  ;;  %v5075_v17 = vshrl.u32 %v4139_v39, 16 }
 0x17e   :  { %v793_v51 = vor.u32 %v792_v58, %v791_v31  ;;  %v800_v11 = vor.u32 %v799_v46, %v3907_v23  ;;  %v4145_v58 = vpack.c.bf16 %v385_v2, %v385_v2  ;;  %v398_v53 = vpop.f32.mrf.mxu0  ;;  %v5130_v27 = vrot.slane %v4082_v18, 6 }
 0x17f   :  { %v577_v30 = vor.u32 %v3826_v59, %v572_v33  ;;  %v4149_v59 = vrot.slane %v5072_v44, 4  ;;  %v573_v46 = vsel %vm3851_vm13, %v568_v1, %v572_v33  ;;  %v5076_v2 = vrot.slane %v4139_v39, 6 }
 0x180   :  { %v794_v23 = vsel %vm3831_vm12, %v790_v15, %v793_v51  ;;  %v795_v31 = vrot.slane %v793_v51, 4  ;;  %v4156_v7 = vrot.slane %v5130_v27, 4  ;;  %v4161_v15 = vunpack.c.l.b16 %v421_v3 }
 0x181   :  { %v578_v32 = vrot.slane %v577_v30, 4  ;;  %v4169_v27 = vrot.slane %v5075_v17, 4  ;;  %v4199_v17 = vpack.c.bf16 %v398_v53, %v398_v53 }
 0x182   :  { %v801_v51 = vsel %vm3831_vm12, %v795_v31, %v800_v11  ;;  %5131 = vst [vmem:[#allocation22_spill] sm:$0xff] %v4161_v15  ;;  %v826_v11 = vshrl.u32 %v4145_v58, 16 }
 0x183   :  { %v2843_v44 = vcombine.low %v794_v23, %v801_v51  ;;  %v583_v6 = vsel %vm3851_vm13, %v578_v32, %v582_v5  ;;  %v4178_v5 = vpack.c.bf16 %v4129_v4, %v4129_v4  ;;  %v5132_v23 = vrot.slane %v3756_v10, 6  ;;  %v3166_v32 = vpop.f32.mrf.mxu0 }
 0x184   :  { %v2827_v30 = vcombine.low %v573_v46, %v583_v6  ;;  %v5133_v6 = vrot.slane %v3891_v29, 10  ;;  %v5134_v46 = vrot.slane %v3862_v0, 6  ;;  %v4194_v51 = vrot.slane %v5076_v2, 4 }
 0x185   :  { %1023 = vrot.lane.b32.xlu0 %v2843_v44, %s3362_s27  ;;  %v5080_v33 = vshrl.u32 %v4178_v5, 16  ;;  %v841_v3 = vshrl.u32 %v4199_v17, 16  ;;  %v5139_v2 = vrot.slane %v4178_v5, 6 }
 0x186   :  { %v889_v31 = vsel %vm3692_vm7, %v5133_v6, %v5132_v23  ;;  %v892_v44 = vsel %vm3692_vm7, %v3846_v50, %v5134_v46  ;;  %959 = vrot.lane.b32.xlu1 %v2827_v30, %s3362_s27  ;;  %v4201_v23 = vrot.slane %v826_v11, 5  ;;  %v5136_v6 = vshrl.u32 %v4054_v40, 16  ;;  %v401_v30 = vpop.f32.mrf.mxu0 }
 0x187   :  { %v4197_v1 = vcombine.low %v889_v31, %v892_v44  ;;  %v804_v44 = vor.u32 %v4020_v45, %v4018_v56  ;;  %v4221_v46 = vrot.slane %v5080_v33, 4  ;;  %v5137_v31 = vshll.u32 %v4054_v40, 16 }
 0x188   :  { %v806_v26 = vrot.slane %v5136_v6, 5  ;;  %v5138_v45 = vshll.u32 %v3918_v43, 16  ;;  %v591_v11 = vor.u32 %v4016_v9, %v4014_v61  ;;  %v4231_v57 = vrot.slane %v5139_v2, 4 }
 0x189   :  { %5135 = vst [vmem:[#allocation23_spill] sm:$0xff] %v4197_v1  ;;  %2919 = vmatmul.mubr.msk.bf16.gmra.mxu0 %vm1057_vm6, %v4197_v1  ;;  %v807_v50 = vrot.slane %v5137_v31, 6  ;;  %v5141_v6 = vmov %v5137_v31  ;;  %v424_v1 = vpack.c.bf16 %v3166_v32, %v4129_v4  ;;  %v4236_v33 = vpack.c.bf16 %v3166_v32, %v3166_v32 }
 0x18a   :  { %1731 = vmatprep.mubr.bf16.mxu0 %v5113_v47  ;;  %v814_v56 = vrot.slane %v5138_v45, 6  ;;  %5140 = vst [vmem:[#allocation24_spill] sm:$0xff] %v4231_v57  ;;  %v596_v15 = vrot.slane %v5141_v6, 5  ;;  %v805_v35 = vrot.slane %v804_v44, 4  ;;  %v592_v31 = vrot.slane %v591_v11, 4 }
 0x18b   :  { %v808_v0 = vor.u32 %v807_v50, %v806_v26  ;;  %v423_v13 = vpack.c.bf16 %v401_v30, %v398_v53  ;;  %v4238_v63 = vrot.slane %v841_v3, 5  ;;  %v5142_v9 = vshll.u32 %v3918_v43, 16 }
 0x18c   :  { %v815_v45 = vor.u32 %v814_v56, %v3998_v12  ;;  %v601_v61 = vor.u32 %v4089_v16, %v596_v15  ;;  %v4246_v4 = vunpack.c.l.b16 %v424_v1  ;;  %v676_v32 = vshll.u32 %v4236_v33, 16 }
 0x18d   :  { %v606_v2 = vrot.slane %v5142_v9, 5  ;;  %v809_v6 = vsel %vm3831_vm12, %v805_v35, %v808_v0  ;;  %v810_v57 = vrot.slane %v808_v0, 4  ;;  %v856_v53 = vshrl.u32 %v4236_v33, 16 }
 0x18e   :  { %v602_v26 = vrot.slane %v601_v61, 4  ;;  %v4250_v3 = vunpack.c.h.b16 %v423_v13  ;;  %v4252_v50 = vpack.c.bf16 %v401_v30, %v401_v30  ;;  %v597_v16 = vsel %vm3851_vm13, %v592_v31, %v596_v15 }
 0x18f   :  { %v816_v12 = vsel %vm3831_vm12, %v810_v57, %v815_v45  ;;  %v615_v35 = vor.u32 %v4041_v20, %v4039_v8  ;;  %v5143_v0 = vshll.u32 %v4082_v18, 16  ;;  %v919_v45 = vrot.slane %v4236_v33, 6 }
 0x190   :  { %v2844_v44 = vcombine.low %v809_v6, %v816_v12  ;;  %v607_v11 = vsel %vm3851_vm13, %v602_v26, %v606_v2  ;;  %v657_v13 = vshrl.u32 %v4252_v50, 16  ;;  %v660_v30 = vshll.u32 %v4252_v50, 16 }
 0x191   :  { %v620_v1 = vrot.slane %v5143_v0, 5  ;;  %v2828_v56 = vcombine.low %v597_v16, %v607_v11  ;;  %v4271_v8 = vrot.slane %v856_v53, 5  ;;  %v616_v9 = vrot.slane %v615_v35, 4 }
 0x192   :  { %1025 = vrot.lane.b32.xlu0 %v2844_v44, %s3362_s27  ;;  %v4273_v20 = vrot.slane %v657_v13, 4  ;;  %v4275_v31 = vrot.slane %v660_v30, 5  ;;  %v847_v61 = vrot.slane %v657_v13, 5  ;;  %v5144_v6 = vshll.u32 %v4145_v58, 16 }
 0x193   :  { %961 = vrot.lane.b32.xlu1 %v2828_v56, %s3362_s27  ;;  %v625_v2 = vor.u32 %v4149_v59, %v620_v1  ;;  %v5145_v12 = vrot.slane %v4054_v40, 6  ;;  %v5146_v16 = vrot.slane %v3977_v48, 10  ;;  %v5147_v0 = vrot.slane %v3918_v43, 6 }
 0x194   :  { %v630_v26 = vrot.slane %v5144_v6, 5  ;;  %v819_v35 = vor.u32 %v4060_v22, %v4048_v52  ;;  %v5148_v59 = vshrl.u32 %v4082_v18, 16  ;;  %v5149_v13 = vshll.u32 %v4082_v18, 16 }
 0x195   :  { %v896_v53 = vsel %vm3692_vm7, %v5146_v16, %v5145_v12  ;;  %v899_v44 = vsel %vm3692_vm7, %v4096_v14, %v5147_v0  ;;  %v848_v6 = vrot.slane %v660_v30, 6  ;;  %v626_v15 = vrot.slane %v625_v2, 4 }
 0x196   :  { %v821_v11 = vrot.slane %v5148_v59, 5  ;;  %v822_v56 = vrot.slane %v5149_v13, 6  ;;  %v4298_v57 = vcombine.low %v896_v53, %v899_v44  ;;  %v5150_v12 = vshll.u32 %v4145_v58, 16 }
 0x197   :  { %v621_v14 = vsel %vm3851_vm13, %v616_v9, %v620_v1  ;;  %v639_v52 = vor.u32 %v4102_v21, %v4100_v42  ;;  %v5151_v22 = vshll.u32 %v4139_v39, 16  ;;  %v631_v30 = vsel %vm3851_vm13, %v626_v15, %v630_v26 }
 0x198   :  { %v829_v16 = vrot.slane %v5150_v12, 6  ;;  %v823_v0 = vor.u32 %v822_v56, %v821_v11  ;;  %2920 = vmatmul.mubr.msk.bf16.gmra.mxu0 %vm1057_vm6, %v4298_v57  ;;  %v820_v2 = vrot.slane %v819_v35, 4  ;;  %v834_v44 = vor.u32 %v4108_v34, %v4106_v36 }
 0x199   :  { %v644_v59 = vrot.slane %v5151_v22, 5  ;;  %v2829_v1 = vcombine.low %v621_v14, %v631_v30  ;;  %v640_v11 = vrot.slane %v639_v52, 4  ;;  %v5152_v21 = vshll.u32 %v4199_v17, 16  ;;  %1741 = vmatprep.mubr.bf16.mxu0 %v5113_v47 }
 0x19a   :  { %v830_v53 = vor.u32 %v829_v16, %v4201_v23  ;;  %v825_v9 = vrot.slane %v823_v0, 4  ;;  %v824_v15 = vsel %vm3831_vm12, %v820_v2, %v823_v0  ;;  %v5153_v35 = vshrl.u32 %v4139_v39, 16 }
 0x19b   :  { %v654_v42 = vrot.slane %v5152_v21, 5  ;;  %v649_v26 = vor.u32 %v4169_v27, %v644_v59  ;;  %v5154_v23 = vmov %v5151_v22  ;;  %963 = vrot.lane.b32.xlu1 %v2829_v1, %s3362_s27  ;;  %v645_v36 = vsel %vm3851_vm13, %v640_v11, %v644_v59 }
 0x19c   :  { %v836_v13 = vrot.slane %v5153_v35, 5  ;;  %v837_v56 = vrot.slane %v5154_v23, 6  ;;  %v831_v34 = vsel %vm3831_vm12, %v825_v9, %v830_v53  ;;  %v835_v12 = vrot.slane %v834_v44, 4 }
 0x19d   :  { %v5155_v16 = vmov %v5152_v21  ;;  %v2845_v0 = vcombine.low %v824_v15, %v831_v34  ;;  %v650_v27 = vrot.slane %v649_v26, 4  ;;  %v5156_v22 = vrot.slane %v4145_v58, 6 }
 0x19e   :  { %v844_v14 = vrot.slane %v5155_v16, 6  ;;  %v838_v52 = vor.u32 %v837_v56, %v836_v13  ;;  %v5157_v53 = vrot.slane %v4082_v18, 6  ;;  %v5158_v1 = vrot.slane %v3993_v25, 10 }
 0x19f   :  { %v906_v30 = vsel %vm3692_vm7, %v4156_v7, %v5156_v22  ;;  %v849_v44 = vor.u32 %v848_v6, %v847_v61  ;;  %v5159_v9 = vshrl.u32 %v4178_v5, 16  ;;  %1027 = vrot.lane.b32.xlu0 %v2845_v0, %s3362_s27  ;;  %v655_v21 = vsel %vm3851_vm13, %v650_v27, %v654_v42 }
 0x1a0   :  { %v845_v2 = vor.u32 %v844_v14, %v4238_v63  ;;  %v903_v59 = vsel %vm3692_vm7, %v5158_v1, %v5157_v53  ;;  %v840_v15 = vrot.slane %v838_v52, 4  ;;  %v5160_v63 = vshll.u32 %v4178_v5, 16 }
 0x1a1   :  { %v851_v11 = vrot.slane %v5159_v9, 5  ;;  %v4349_v7 = vcombine.low %v903_v59, %v906_v30  ;;  %v2830_v35 = vcombine.low %v645_v36, %v655_v21  ;;  %v850_v13 = vrot.slane %v849_v44, 4 }
 0x1a2   :  { %v852_v26 = vrot.slane %v5160_v63, 6  ;;  %v859_v23 = vrot.slane %v676_v32, 6  ;;  %v663_v61 = vor.u32 %v4275_v31, %v4273_v20  ;;  %v839_v6 = vsel %vm3831_vm12, %v835_v12, %v838_v52 }
 0x1a3   :  { %v846_v42 = vsel %vm3831_vm12, %v840_v15, %v845_v2  ;;  %2921 = vmatmul.mubr.msk.bf16.gmra.mxu0 %vm1057_vm6, %v4349_v7  ;;  %v5161_v34 = vmov %v5160_v63  ;;  %965 = vrot.lane.b32.xlu1 %v2830_v35, %s3362_s27  ;;  %v678_v20 = vrot.slane %v676_v32, 5  ;;  %v2815_v22 = vrot.slane %v4252_v50, 9 }
 0x1a4   :  { %v853_v56 = vor.u32 %v852_v26, %v851_v11  ;;  %v668_v36 = vrot.slane %v5161_v34, 5  ;;  %v2846_v16 = vcombine.low %v839_v6, %v846_v42  ;;  %v860_v14 = vor.u32 %v859_v23, %v4271_v8  ;;  %1751 = vmatprep.mubr.bf16.mxu0 %v5113_v47 }
 0x1a5   :  { %v664_v0 = vrot.slane %v663_v61, 4  ;;  %v5164_v8 = vrot.slane %v4199_v17, 6  ;;  %v2823_v30 = vrot.slane %v4252_v50, 10  ;;  %v5165_v53 = vrot.slane %v4139_v39, 6 }
 0x1a6   :  { %v854_v12 = vsel %vm3831_vm12, %v850_v13, %v853_v56  ;;  %v855_v27 = vrot.slane %v853_v56, 4  ;;  %v673_v52 = vor.u32 %v4221_v46, %v668_v36  ;;  %1029 = vrot.lane.b32.xlu0 %v2846_v16, %s3362_s27  ;;  %v5166_v1 = vrot.slane %v4058_v49, 10  ;;  %v5179_v16 = vld [vmem:[#allocation9_spill] sm:$0xff] }
 0x1a7   :  { %v913_v32 = vsel %vm3692_vm7, %v4194_v51, %v5164_v8  ;;  %v669_v2 = vsel %vm3851_vm13, %v664_v0, %v668_v36  ;;  %v5167_v9 = vrot.slane %v3676_v54, 5  ;;  %v5168_v50 = vrot.slane %v3623_v24, 9 }
 0x1a8   :  { %v910_v46 = vsel %vm3692_vm7, %v5166_v1, %v5165_v53  ;;  %v861_v59 = vsel %vm3831_vm12, %v855_v27, %v860_v14  ;;  %v674_v51 = vrot.slane %v673_v52, 4  ;;  %v5170_v26 = vrot.slane %v3687_v60, 5  ;;  %v5182_v27 = vld [vmem:[#allocation11_spill] sm:$0xff]  ;;  %v5186_v53 = vld [vmem:[#allocation12_spill] sm:$0xff] }
 0x1a9   :  { %v2854_v44 = vcombine.low %v910_v46, %v913_v32  ;;  %v686_v11 = vsel %vm4372_vm0, %v5168_v50, %v5167_v9  ;;  %v2847_v21 = vcombine.low %v854_v12, %v861_v59  ;;  %v5169_v15 = vmov %v5167_v9 }
 0x1aa   :  { %v687_v63 = vrot.slane %v5169_v15, 4  ;;  %v5171_v35 = vrot.slane %v3626_v28, 9  ;;  %v5172_v13 = vmov %v5170_v26  ;;  %v679_v24 = vsel %vm3851_vm13, %v674_v51, %v678_v20 }
 0x1ab   :  { %v694_v23 = vrot.slane %v5172_v13, 4  ;;  %v5173_v61 = vrot.slane %v3740_v38, 5  ;;  %v5174_v6 = vrot.slane %v3680_v55, 9  ;;  %v5176_v56 = vrot.slane %v3756_v10, 5  ;;  %1031 = vrot.lane.b32.xlu0 %v2847_v21, %s3362_s27  ;;  %2922 = vmatmul.mubr.msk.bf16.gmra.mxu0 %vm1057_vm6, %v2854_v44 }
 0x1ac   :  { %v4411_v37 = vsel %vm4372_vm0, %v5171_v35, %v5170_v26  ;;  %v5177_v34 = vrot.slane %v3891_v29, 9  ;;  %v2831_v41 = vcombine.low %v669_v2, %v679_v24  ;;  %v5178_v55 = vrot.slane %v3612_v19, 5  ;;  %1761 = vmatprep.mubr.bf16.mxu0 %v5113_v47 }
 0x1ad   :  { %v4423_v54 = vsel %vm4372_vm0, %v5174_v6, %v5173_v61  ;;  %v5175_v28 = vmov %v5173_v61  ;;  %v5180_v14 = vrot.slane %v5179_v16, 5  ;;  %v5181_v29 = vmov %v5176_v56  ;;  %v3311_v16 = vld [vmem:[%s5041_s2 + $0xb0] ss:$12 sps:$4 sm:$0xff]  }
 0x1ae   :  { %v701_v42 = vrot.slane %v5175_v28, 4  ;;  %v4433_v60 = vsel %vm4372_vm0, %v5177_v34, %v5176_v56  ;;  %v689_v36 = vsel %vm4372_vm0, %v687_v63, %v5178_v55  ;;  %v708_v0 = vrot.slane %v5181_v29, 4  ;;  %967 = vrot.lane.b32.xlu1 %v2831_v41, %s3362_s27  ;;  %v5205_v55 = vld [vmem:[#allocation21_spill] sm:$0xff]  ;;  %v5208_v29 = vld [vmem:[#allocation3_spill] sm:$0xff] }
 0x1af   :  { %v4444_v38 = vsel %vm4372_vm0, %v694_v23, %v5180_v14  ;;  %v2832_v20 = vcombine.low %v686_v11, %v689_v36  ;;  %v5183_v19 = vrot.slane %v5182_v27, 5  ;;  %v5184_v8 = vrot.slane %v4054_v40, 5  ;;  %v3315_v27 = vld [vmem:[%s5041_s2 + $0x80] ss:$12 sps:$4 sm:$0xff]  }
 0x1b0   :  { %v2833_v12 = vcombine.low %v4411_v37, %v4444_v38  ;;  %v5185_v32 = vrot.slane %v3977_v48, 9  ;;  %v5187_v1 = vrot.slane %v5186_v53, 5  ;;  %v5189_v51 = vrot.slane %v4082_v18, 5  ;;  %v5207_v38 = vld [vmem:[#allocation4_spill] sm:$0xff] }
 0x1b1   :  { %v4455_v52 = vsel %vm4372_vm0, %v701_v42, %v5183_v19  ;;  %v5188_v59 = vmov %v5184_v8  ;;  %v5190_v9 = vrot.slane %v3993_v25, 9  ;;  %v5192_v15 = vrot.slane %v4139_v39, 5  ;;  %v3316_v19 = vld [vmem:[%s5041_s2 + $0x128] ss:$12 sps:$4 sm:$0xff]   ;;  %v3318_v53 = vld [vmem:[%s5041_s2 + $0x110] ss:$12 sps:$4 sm:$0xff]  }
 0x1b2   :  { %v4463_v10 = vsel %vm4372_vm0, %v5185_v32, %v5184_v8  ;;  %v2834_v2 = vcombine.low %v4423_v54, %v4455_v52  ;;  %v4473_v46 = vsel %vm4372_vm0, %v708_v0, %v5187_v1  ;;  %v715_v48 = vrot.slane %v5188_v59, 4  ;;  %v3317_v8 = vld [vmem:[%s5041_s2 + $0x68] ss:$12 sps:$4 sm:$0xff]  }
 0x1b3   :  { %v4483_v50 = vsel %vm4372_vm0, %v5190_v9, %v5189_v51  ;;  %v2835_v47 = vcombine.low %v4433_v60, %v4473_v46  ;;  %v5191_v11 = vmov %v5189_v51  ;;  %v5193_v63 = vrot.slane %v4058_v49, 9  ;;  %v5211_v51 = vld [vmem:[#allocation5_spill] sm:$0xff] }
 0x1b4   :  { %v722_v21 = vrot.slane %v5191_v11, 4  ;;  %v5194_v25 = vmov %v5192_v15  ;;  %v5195_v35 = vrot.slane %v4178_v5, 6  ;;  %v5196_v13 = vrot.slane %v3918_v43, 5 }
 0x1b5   :  { %v4495_v40 = vsel %vm4372_vm0, %v5193_v63, %v5192_v15  ;;  %v729_v26 = vrot.slane %v5194_v25, 4  ;;  %v5197_v49 = vrot.slane %v4178_v5, 5  ;;  %v5200_v6 = vrot.slane %v4199_v17, 5  ;;  %v3320_v15 = vld [vmem:[%s5041_s2 + $0xf8] ss:$12 sps:$4 sm:$0xff]  }
 0x1b6   :  { %v917_v37 = vsel %vm3692_vm7, %v2823_v30, %v5195_v35  ;;  %v4507_v18 = vsel %vm4372_vm0, %v715_v48, %v5196_v13  ;;  %v5199_v30 = vrot.slane %v4145_v58, 5  ;;  %v5202_v56 = vrot.slane %v4236_v33, 5  ;;  %v5206_v33 = vld [vmem:[#allocation23_spill] sm:$0xff]  ;;  %v5210_v48 = vld [vmem:[#allocation10_spill] sm:$0xff] }
 0x1b7   :  { %v4513_v23 = vsel %vm4372_vm0, %v2815_v22, %v5197_v49  ;;  %v5198_v39 = vmov %v5197_v49  ;;  %v2836_v61 = vcombine.low %v4463_v10, %v4507_v18  ;;  %v4529_v28 = vsel %vm4372_vm0, %v729_v26, %v5200_v6  ;;  %v5201_v22 = vld [vmem:[#allocation24_spill] sm:$0xff]  ;;  %v5213_v49 = vld [vmem:[#allocation7_spill] sm:$0xff] }
 0x1b8   :  { %v736_v24 = vrot.slane %v5198_v39, 4  ;;  %v4523_v43 = vsel %vm4372_vm0, %v722_v21, %v5199_v30  ;;  %v920_v5 = vsel %vm3692_vm7, %v5201_v22, %v919_v45  ;;  %v2838_v58 = vcombine.low %v4495_v40, %v4529_v28  ;;  %v5204_v45 = vld [vmem:[#allocation16_spill] sm:$0xff]  ;;  %v5214_v39 = vld [vmem:[#allocation6_spill] sm:$0xff]  ;;  %v5216_v22 = vld [vmem:[#allocation13_spill] sm:$0xff] }
 0x1b9   :  { %v2837_v42 = vcombine.low %v4483_v50, %v4523_v43  ;;  %v2855_v34 = vcombine.low %v917_v37, %v920_v5  ;;  %v5209_v0 = vpack.c.bf16 %v5207_v38, %v5208_v29  ;;  %v5212_v9 = vpack.c.b16 %v5210_v48, %v5211_v51  ;;  %v3319_v21 = vld [vmem:[%s5041_s2 + $0x50] ss:$12 sps:$4 sm:$0xff]   ;;  %v3322_v63 = vld [vmem:[%s5041_s2 + $0xe0] ss:$12 sps:$4 sm:$0xff]   ;;  %v3324_v13 = vld [vmem:[%s5041_s2 + $0xc8] ss:$12 sps:$4 sm:$0xff]  }
 0x1ba   :  { %v4544_v17 = vsel %vm4372_vm0, %v736_v24, %v5202_v56  ;;  %v3323_v35 = vld [vmem:[%s5041_s2 + $0x20] ss:$12 sps:$4 sm:$0xff]   ;;  %v5215_v24 = vpack.c.bf16 %v5213_v49, %v5214_v39  ;;  %v3325_v6 = vld [vmem:[%s5041_s2 + $0x8] ss:$12 sps:$4 sm:$0xff]   ;;  %v5228_v40 = vpack.c.b16 %v4246_v4, %v4250_v3  ;;  %vm2215_vm7 = vcmask 1043459  }
 0x1bb   :  { %v2839_v41 = vcombine.low %v4513_v23, %v4544_v17  ;;  %2923 = vmatmul.mubr.msk.bf16.gmra.mxu0 %vm1057_vm6, %v2855_v34  ;;  %v5217_v5 = vld [vmem:[#allocation14_spill] sm:$0xff]  ;;  %v5223_v29 = vld [vmem:[#allocation19_spill] sm:$0xff]  ;;  %vm2722_vm13 = vcmask 7168  }
 0x1bc   :  { %3175 = vmatprep.mubr.msk.bf16.mxu0 %vm1057_vm6, %v5203_v62  ;;  %v5218_v56 = vpack.c.b16 %v5216_v22, %v5217_v5  ;;  %v5222_v38 = vld [vmem:[#allocation22_spill] sm:$0xff]  ;;  %v3343_v22 = vld [vmem:[%s5042_s4 + $0xb0] sm:$0xff]  }
 0x1bd   :  { %v5224_v10 = vpack.c.b16 %v5222_v38, %v5223_v29  ;;  %v5226_v50 = vld [vmem:[#allocation18_spill] sm:$0xff] }
 0x1be   :  { %v3333_v48 = vld [vmem:[%s5042_s4 + $0x20] sm:$0xff]  }
 0x1bf   :  { %v3341_v49 = vld [vmem:[%s5042_s4] sm:$0xff]  }
 0x1c3   :  { %3176 = vmatmul.mubr.msk.bf16.vlgmr.msra.gmra.mxu0 %vm1057_vm6, %v5204_v45 }
 0x1c4   :  { %3179 = vmatprep.mubr.msk.bf16.mxu0 %vm1057_vm6, %v5205_v55 }
 0x1cb   :  { %3180 = vmatmul.mubr.msk.bf16.gmra.mxu0 %vm1057_vm6, %v5206_v33  ;;  %v5219_v33 = vld [vmem:[#allocation17_spill] sm:$0xff] }
 0x1cc   :  { %3183 = vmatprep.mubr.msk.bf16.mxu0 %vm1057_vm6, %v4298_v57 }
 0x1d3   :  { %3184 = vmatmul.mubr.msk.bf16.gmra.mxu0 %vm1057_vm6, %v4349_v7  ;;  %v3312_v7 = vld [vmem:[%s5041_s2 + $0x158] ss:$12 sps:$4 sm:$0xff]  }
 0x1d4   :  { %3187 = vmatprep.mubr.msk.bf16.mxu0 %vm1057_vm6, %v2854_v44  ;;  %v1018_v36 = vpop.permute.xlu0 %1017  ;;  %v3313_v44 = vld [vmem:[%s5041_s2 + $0x98] ss:$12 sps:$4 sm:$0xff]  }
 0x1d5   :  { %v954_v31 = vpop.permute.xlu1 %953  ;;  %v4567_v14 = vsel %vm1057_vm6, %v2832_v20, %v1018_v36  ;;  %v3314_v20 = vld [vmem:[%s5041_s2 + $0x140] ss:$12 sps:$4 sm:$0xff]  }
 0x1d6   :  { %v4573_v57 = vsel %vm1057_vm6, %v5209_v0, %v954_v31  ;;  %1578 = vmatprep.mubr.bf16.mxu1 %v4567_v14  ;;  %v5220_v31 = vld [vmem:[#allocation15_spill] sm:$0xff] }
 0x1d7   :  { %1579 = vmatmul.mubr.bf16.vlgmr.msra.gmra.mxu1 %v4573_v57  ;;  %v5221_v60 = vpack.c.bf16 %v5219_v33, %v5220_v31 }
 0x1d8   :  { %3013 = vmatpush3.bf16.msra.mxu1 %v3311_v16 }
 0x1d9   :  { %3014 = vmatprep.subr.bf16.mxu1 %v3312_v7 }
 0x1db   :  { %3188 = vmatmul.mubr.msk.bf16.gmra.mxu0 %vm1057_vm6, %v2855_v34  ;;  %v956_v32 = vpop.permute.xlu1 %955 }
 0x1dc   :  { %3015 = vmatpush3.bf16.msra.mxu1 %v3313_v44  ;;  %v1064_v11 = vsel %vm1057_vm6, %v5212_v9, %v956_v32  ;;  %v3330_v32 = vld [vmem:[%s5042_s4 + $0x68] sm:$0xff]  }
 0x1dd   :  { %3016 = vmatprep.subr.bf16.mxu1 %v3314_v20  ;;  %v5225_v20 = vld [vmem:[#allocation20_spill] sm:$0xff] }
 0x1de   :  { %v5227_v43 = vpack.c.bf16 %v5225_v20, %v5226_v50 }
 0x1e0   :  { %3017 = vmatpush3.bf16.msra.mxu1 %v3315_v27 }
 0x1e1   :  { %3018 = vmatprep.subr.bf16.mxu1 %v3316_v19 }
 0x1e3   :  { %v1020_v1 = vpop.permute.xlu0 %1019 }
 0x1e4   :  { %v1096_v59 = vsel %vm1057_vm6, %v2833_v12, %v1020_v1  ;;  %3019 = vmatpush3.bf16.msra.mxu1 %v3317_v8  ;;  %v3321_v12 = vld [vmem:[%s5041_s2 + $0x38] ss:$12 sps:$4 sm:$0xff]   ;;  %v3329_v8 = vld [vmem:[%s5042_s4 + $0x30] sm:$0xff]  }
 0x1e5   :  { %1588 = vmatprep.mubr.bf16.mxu1 %v1096_v59  ;;  %3020 = vmatprep.subr.bf16.mxu1 %v3318_v53  ;;  %v958_v25 = vpop.permute.xlu1 %957  ;;  %v3331_v53 = vld [vmem:[%s5042_s4 + $0x28] sm:$0xff]   ;;  %v3332_v1 = vld [vmem:[%s5042_s4 + $0x60] sm:$0xff]  }
 0x1e6   :  { %1589 = vmatmul.mubr.bf16.gmra.mxu1 %v1064_v11  ;;  %v1068_v30 = vsel %vm1057_vm6, %v5215_v24, %v958_v25  ;;  %v3342_v24 = vld [vmem:[%s5042_s4 + $0xb8] sm:$0xff]  }
 0x1e8   :  { %3021 = vmatpush3.bf16.msra.mxu1 %v3319_v21  ;;  %v3335_v21 = vld [vmem:[%s5042_s4 + $0x18] sm:$0xff]  }
 0x1e9   :  { %3022 = vmatprep.subr.bf16.mxu1 %v3320_v15  ;;  %v3336_v15 = vld [vmem:[%s5042_s4 + $0x50] sm:$0xff]  }
 0x1ec   :  { %3023 = vmatpush3.bf16.msra.mxu1 %v3321_v12  ;;  %v3337_v12 = vld [vmem:[%s5042_s4 + $0x10] sm:$0xff]  }
 0x1ed   :  { %3024 = vmatprep.subr.bf16.mxu1 %v3322_v63 }
 0x1ee   :  { %v1022_v26 = vpop.permute.xlu0 %1021 }
 0x1ef   :  { %v1100_v37 = vsel %vm1057_vm6, %v2834_v2, %v1022_v26  ;;  %v3338_v26 = vld [vmem:[%s5042_s4 + $0x48] sm:$0xff]  }
 0x1f0   :  { %1598 = vmatprep.mubr.bf16.mxu1 %v1100_v37  ;;  %3025 = vmatpush3.bf16.msra.mxu1 %v3323_v35  ;;  %v3339_v35 = vld [vmem:[%s5042_s4 + $0x8] sm:$0xff]  }
 0x1f1   :  { %1599 = vmatmul.mubr.bf16.gmra.mxu1 %v1068_v30  ;;  %3026 = vmatprep.subr.bf16.mxu1 %v3324_v13 }
 0x1f4   :  { %3027 = vmatpush3.bf16.msra.mxu1 %v3325_v6  ;;  %v3363_v6 = vmov 0.0  }
 0x1f5   :  { %3191 = vmatprep.subr.bf16.mxu1 %v3363_v6 }
 0x1f7   :  { %v1024_v54 = vpop.permute.xlu0 %1023 }
 0x1f8   :  { %v960_v52 = vpop.permute.xlu1 %959  ;;  %v1104_v2 = vsel %vm1057_vm6, %v2835_v47, %v1024_v54 }
 0x1f9   :  { %1608 = vmatprep.mubr.bf16.mxu1 %v1104_v2  ;;  %v1072_v34 = vsel %vm1057_vm6, %v5218_v56, %v960_v52 }
 0x1fa   :  { %1609 = vmatmul.mubr.bf16.gmra.mxu1 %v1072_v34 }
 0x204   :  { %v1026_v62 = vpop.permute.xlu0 %1025 }
 0x205   :  { %v962_v45 = vpop.permute.xlu1 %961  ;;  %v1108_v55 = vsel %vm1057_vm6, %v2836_v61, %v1026_v62 }
 0x206   :  { %1618 = vmatprep.mubr.bf16.mxu1 %v1108_v55  ;;  %v1076_v46 = vsel %vm1057_vm6, %v5221_v60, %v962_v45  ;;  %v3344_v45 = vld [vmem:[%s5042_s4 + $0xa8] sm:$0xff]  }
 0x207   :  { %1619 = vmatmul.mubr.bf16.gmra.mxu1 %v1076_v46 }
 0x20d   :  { %v964_v47 = vpop.permute.xlu1 %963 }
 0x20e   :  { %v1080_v18 = vsel %vm1057_vm6, %v5224_v10, %v964_v47 }
 0x211   :  { %v1028_v36 = vpop.permute.xlu0 %1027 }
 0x212   :  { %v1112_v16 = vsel %vm1057_vm6, %v2837_v42, %v1028_v36  ;;  %v3345_v36 = vld [vmem:[%s5042_s4 + $0xa0] sm:$0xff]  }
 0x213   :  { %1628 = vmatprep.mubr.bf16.mxu1 %v1112_v16 }
 0x214   :  { %1629 = vmatmul.mubr.bf16.gmra.mxu1 %v1080_v18 }
 0x215   :  { %v966_v7 = vpop.permute.xlu1 %965 }
 0x216   :  { %v1084_v42 = vsel %vm1057_vm6, %v5227_v43, %v966_v7  ;;  %v3346_v7 = vld [vmem:[%s5042_s4 + $0x98] sm:$0xff]  }
 0x217   :  { %v4674_v4 = vpop.f32.mrf.mxu0 }
 0x218   :  { %v1030_v61 = vpop.permute.xlu0 %1029 }
 0x219   :  { %v1116_v0 = vsel %vm1057_vm6, %v2838_v58, %v1030_v61  ;;  %v4676_v3 = vpop.f32.mrf.mxu0  ;;  %v3326_v58 = vld [vmem:[%s5042_s4 + $0x78] sm:$0xff]  }
 0x21a   :  { %1638 = vmatprep.mubr.bf16.mxu1 %v1116_v0  ;;  %3088 = vmatprep.subr.bf16.mxu0 %v3326_v58 }
 0x21b   :  { %v4678_v23 = vpop.f32.mrf.mxu0 }
 0x21c   :  { %1639 = vmatmul.mubr.bf16.gmra.mxu1 %v1084_v42 }
 0x21d   :  { %v1032_v44 = vpop.permute.xlu0 %1031  ;;  %v4683_v17 = vpop.f32.mrf.mxu0 }
 0x21e   :  { %v1120_v27 = vsel %vm1057_vm6, %v2839_v41, %v1032_v44  ;;  %v3327_v41 = vld [vmem:[%s5042_s4 + $0x38] sm:$0xff]  }
 0x21f   :  { %1648 = vmatprep.mubr.bf16.mxu1 %v1120_v27  ;;  %3089 = vmatpush3.bf16.msra.mxu0 %v3327_v41 }
 0x220   :  { %v968_v19 = vpop.permute.xlu1 %967 }
 0x221   :  { %v1088_v28 = vsel %vm1057_vm6, %v5228_v40, %v968_v19  ;;  %v3347_v19 = vld [vmem:[%s5042_s4 + $0x90] sm:$0xff]  }
 0x224   :  { %1649 = vmatmul.mubr.bf16.gmra.mxu1 %v1088_v28 }
 0x225   :  { %1804 = vmatprep.mubr.bf16.mxu1 %v4567_v14 }
 0x22a   :  { %v4688_v14 = vpop.f32.mrf.mxu0 }
 0x22c   :  { %1805 = vmatmul.mubr.bf16.vlgmr.msra.gmra.mxu1 %v4573_v57  ;;  %v3328_v57 = vld [vmem:[%s5042_s4 + $0x70] sm:$0xff]  }
 0x22d   :  { %1812 = vmatprep.mubr.bf16.mxu1 %v1096_v59  ;;  %3090 = vmatprep.subr.bf16.mxu0 %v3328_v57  ;;  %v4705_v59 = vpop.f32.mrf.mxu0 }
 0x22e   :  { %3091 = vmatpush3.bf16.msra.mxu0 %v3329_v8  ;;  %3192 = vmatpush3.bf16.msra.mxu1 %v3342_v24 }
 0x22f   :  { %3092 = vmatprep.subr.bf16.mxu0 %v3330_v32  ;;  %v4710_v51 = vpop.f32.mrf.mxu0  ;;  %3193 = vmatprep.subr.bf16.mxu1 %v3363_v6  ;;  %v3349_v32 = vld [vmem:[%s5042_s4 + $0x80] sm:$0xff]  }
 0x231   :  { %v4712_v9 = vpop.f32.mrf.mxu0 }
 0x232   :  { %3093 = vmatpush3.bf16.msra.mxu0 %v3331_v53  ;;  %3194 = vmatpush3.bf16.msra.mxu1 %v3343_v22 }
 0x233   :  { %3094 = vmatprep.subr.bf16.mxu0 %v3332_v1  ;;  %3195 = vmatprep.subr.bf16.mxu1 %v3363_v6 }
 0x234   :  { %1813 = vmatmul.mubr.bf16.gmra.mxu1 %v1064_v11  ;;  %v3334_v11 = vld [vmem:[%s5042_s4 + $0x58] sm:$0xff]  }
 0x235   :  { %1820 = vmatprep.mubr.bf16.mxu1 %v1100_v37  ;;  %v3340_v37 = vld [vmem:[%s5042_s4 + $0x40] sm:$0xff]  }
 0x236   :  { %3095 = vmatpush3.bf16.msra.mxu0 %v3333_v48  ;;  %3196 = vmatpush3.bf16.msra.mxu1 %v3344_v45 }
 0x237   :  { %3096 = vmatprep.subr.bf16.mxu0 %v3334_v11  ;;  %3197 = vmatprep.subr.bf16.mxu1 %v3363_v6 }
 0x23a   :  { %3097 = vmatpush3.bf16.msra.mxu0 %v3335_v21  ;;  %v4726_v63 = vpop.f32.mrf.mxu0  ;;  %3198 = vmatpush3.bf16.msra.mxu1 %v3345_v36 }
 0x23b   :  { %3098 = vmatprep.subr.bf16.mxu0 %v3336_v15  ;;  %3199 = vmatprep.subr.bf16.mxu1 %v3363_v6 }
 0x23c   :  { %1821 = vmatmul.mubr.bf16.gmra.mxu1 %v1068_v30  ;;  %v4728_v25 = vpop.f32.mrf.mxu0 }
 0x23d   :  { %1828 = vmatprep.mubr.bf16.mxu1 %v1104_v2 }
 0x23e   :  { %3099 = vmatpush3.bf16.msra.mxu0 %v3337_v12  ;;  %v4739_v13 = vpop.f32.mrf.mxu0  ;;  %3200 = vmatpush3.bf16.msra.mxu1 %v3346_v7 }
 0x23f   :  { %3100 = vmatprep.subr.bf16.mxu0 %v3338_v26  ;;  %3201 = vmatprep.subr.bf16.mxu1 %v3363_v6 }
 0x240   :  { %v4744_v39 = vpop.f32.mrf.mxu0 }
 0x242   :  { %3101 = vmatpush3.bf16.msra.mxu0 %v3339_v35  ;;  %3202 = vmatpush3.bf16.msra.mxu1 %v3347_v19 }
 0x243   :  { %3102 = vmatprep.subr.bf16.mxu0 %v3340_v37  ;;  %3203 = vmatprep.subr.bf16.mxu1 %v3363_v6 }
 0x244   :  { %1829 = vmatmul.mubr.bf16.gmra.mxu1 %v1072_v34 }
 0x245   :  { %1836 = vmatprep.mubr.bf16.mxu1 %v1108_v55 }
 0x246   :  { %3103 = vmatpush3.bf16.msra.mxu0 %v3341_v49 }
 0x247   :  { %3211 = vmatprep.subr.bf16.mxu0 %v3363_v6 }
 0x249   :  { %v4749_v30 = vpop.f32.mrf.mxu0 }
 0x24b   :  { %v4754_v2 = vpop.f32.mrf.mxu0 }
 0x24c   :  { %1837 = vmatmul.mubr.bf16.gmra.mxu1 %v1076_v46 }
 0x24d   :  { %1844 = vmatprep.mubr.bf16.mxu1 %v1112_v16  ;;  %v4759_v56 = vpop.f32.mrf.mxu0 }
 0x24f   :  { %v4762_v62 = vpop.f32.mrf.mxu0 }
 0x254   :  { %1845 = vmatmul.mubr.bf16.gmra.mxu1 %v1080_v18  ;;  %v5229_v18 = vlaneseq }
 0x255   :  { %1852 = vmatprep.mubr.bf16.mxu1 %v1116_v0 }
 0x256   :  { %v4785_v61 = vshrl.u32 %v5229_v18, 7 }
 0x258   :  { %v4767_v33 = vpop.f32.mrf.mxu0  ;;  %v4793_v50 = vadd.s32 8, %v4785_v61 }
 0x25a   :  { %v4770_v46 = vpop.f32.mrf.mxu0  ;;  %vm1970_vm1 = vcmp.lt.s32.totalorder %v4793_v50, 14  ;;  %vm2048_vm3 = vcmp.lt.s32.totalorder %v4793_v50, 13  ;;  %vm2126_vm12 = vcmp.lt.s32.totalorder %v4793_v50, 12  ;;  %v2270_v50 = vsub.s32 2, %v4785_v61 }
 0x25c   :  { %1853 = vmatmul.mubr.bf16.gmra.mxu1 %v1084_v42  ;;  %v4775_v16 = vpop.f32.mrf.mxu0 }
 0x25d   :  { %1860 = vmatprep.mubr.bf16.mxu1 %v1120_v27 }
 0x25e   :  { %v4780_v29 = vpop.f32.mrf.mxu0 }
 0x263   :  { %v4790_v44 = vpop.f32.mrf.mxu0 }
 0x264   :  { %1861 = vmatmul.mubr.bf16.gmra.mxu1 %v1088_v28  ;;  %v3348_v28 = vld [vmem:[%s5042_s4 + $0x88] sm:$0xff]  }
 0x265   :  { %v4798_v42 = vpop.f32.mrf.mxu0  ;;  %3207 = vmatprep.mubr.msk.bf16.mxu1 %vm3364_vm2, %v3363_v6  ;;  %3204 = vmatpush3.bf16.msra.mxu1 %v3348_v28 }
 0x266   :  { %3205 = vmatprep.subr.bf16.mxu1 %v3363_v6 }
 0x269   :  { %3206 = vmatpush3.bf16.msra.mxu1 %v3349_v32 }
 0x297   :  { %v1580_v54 = vpop.f32.mrf.mxu1 }
 0x298   :  { %v1694_v41 = vadd.f32 %v4674_v4, %v1580_v54 }
 0x299   :  { %v1582_v52 = vpop.f32.mrf.mxu1 }
 0x29a   :  { %v1696_v4 = vadd.f32 %v4676_v3, %v1582_v52 }
 0x29b   :  { %v1584_v5 = vpop.f32.mrf.mxu1 }
 0x29c   :  { %v1698_v27 = vadd.f32 %v4678_v23, %v1584_v5  ;;  %v4813_v23 = vpop.f32.mrf.mxu0 }
 0x29d   :  { %v1586_v34 = vpop.f32.mrf.mxu1 }
 0x29e   :  { %v1976_v58 = vsel %vm1970_vm1, %v1698_v27, -1e+30  ;;  %v1700_v8 = vadd.f32 %v4683_v17, %v1586_v34  ;;  %v4824_v1 = vpop.f32.mrf.mxu0 }
 0x29f   :  { %v1991_v53 = vmax.f32 %v1694_v41, %v1976_v58 }
 0x2a0   :  { %v2054_v11 = vsel %vm2048_vm3, %v1700_v8, -1e+30  ;;  %v4829_v21 = vpop.f32.mrf.mxu0 }
 0x2a1   :  { %v1992_v17 = vrot.slane %v1991_v53, 4  ;;  %v2069_v15 = vmax.f32 %v1696_v4, %v2054_v11 }
 0x2a2   :  { %v4833_v24 = vpop.f32.mrf.mxu0 }
 0x2a3   :  { %v1993_v37 = vmax.f32 %v1991_v53, %v1992_v17  ;;  %v2070_v54 = vrot.slane %v2069_v15, 4 }
 0x2a4   :  { %v4841_v45 = vpop.f32.mrf.mxu0 }
 0x2a5   :  { %v1994_v34 = vrot.slane %v1993_v37, 2 }
 0x2a6   :  { %v1590_v55 = vpop.f32.mrf.mxu1 }
 0x2a7   :  { %v1704_v3 = vadd.f32 %v4688_v14, %v1590_v55  ;;  %v1995_v19 = vmax.f32 %v1993_v37, %v1994_v34  ;;  %v4847_v55 = vpop.f32.mrf.mxu0 }
 0x2a8   :  { %v1592_v31 = vpop.f32.mrf.mxu1 }
 0x2aa   :  { %v1594_v60 = vpop.f32.mrf.mxu1 }
 0x2ab   :  { %v1708_v12 = vadd.f32 %v4710_v51, %v1594_v60  ;;  %v1706_v51 = vadd.f32 %v4705_v59, %v1592_v31 }
 0x2ac   :  { %v1596_v47 = vpop.f32.mrf.mxu1 }
 0x2ad   :  { %v1710_v35 = vadd.f32 %v4712_v9, %v1596_v47  ;;  %v1978_v22 = vsel %vm1970_vm1, %v1708_v12, -1e+30  ;;  %v2071_v47 = vmax.f32 %v2069_v15, %v2070_v54 }
 0x2ae   :  { %v1998_v9 = vmax.f32 %v1704_v3, %v1978_v22 }
 0x2af   :  { %v2056_v52 = vsel %vm2048_vm3, %v1710_v35, -1e+30  ;;  %v2072_v58 = vrot.slane %v2071_v47, 2 }
 0x2b0   :  { %v2076_v36 = vmax.f32 %v1706_v51, %v2056_v52  ;;  %v1999_v28 = vrot.slane %v1998_v9, 4 }
 0x2b1   :  { %v4778_v38 = vpop.f32.mrf.mxu1 }
 0x2b2   :  { %v2077_v41 = vrot.slane %v2076_v36, 4 }
 0x2b3   :  { %v4782_v10 = vpop.f32.mrf.mxu1 }
 0x2b5   :  { %v1604_v0 = vpop.f32.mrf.mxu1 }
 0x2b6   :  { %v1718_v18 = vadd.f32 %v4739_v13, %v1604_v0  ;;  %v1714_v13 = vadd.f32 %v4726_v63, %v4778_v38  ;;  %v4865_v63 = vpop.f32.mrf.mxu0  ;;  %v2000_v38 = vmax.f32 %v1998_v9, %v1999_v28 }
 0x2b7   :  { %v1606_v20 = vpop.f32.mrf.mxu1 }
 0x2b8   :  { %v1720_v7 = vadd.f32 %v4744_v39, %v1606_v20  ;;  %v1980_v8 = vsel %vm1970_vm1, %v1718_v18, -1e+30  ;;  %v1996_v20 = vrot.slane %v1995_v19, 1  ;;  %v4880_v22 = vpop.f32.mrf.mxu0  ;;  %v2262_v18 = vsub.s32 0, %v4785_v61 }
 0x2b9   :  { %v2005_v53 = vmax.f32 %v1714_v13, %v1980_v8 }
 0x2ba   :  { %v4796_v43 = vpop.f32.mrf.mxu1  ;;  %v2058_v39 = vsel %vm2048_vm3, %v1720_v7, -1e+30  ;;  %v1767_v7 = vpop.f32.mrf.mxu0 }
 0x2bc   :  { %v4805_v40 = vpop.f32.mrf.mxu1 }
 0x2be   :  { %v1614_v57 = vpop.f32.mrf.mxu1 }
 0x2bf   :  { %v1728_v27 = vadd.f32 %v4759_v56, %v1614_v57  ;;  %v1724_v57 = vadd.f32 %v4749_v30, %v4796_v43 }
 0x2c0   :  { %v1616_v48 = vpop.f32.mrf.mxu1 }
 0x2c1   :  { %v1730_v14 = vadd.f32 %v4762_v62, %v1616_v48  ;;  %v1982_v56 = vsel %vm1970_vm1, %v1728_v27, -1e+30  ;;  %v1726_v48 = vadd.f32 %v4754_v2, %v4805_v40 }
 0x2c2   :  { %v2012_v17 = vmax.f32 %v1724_v57, %v1982_v56 }
 0x2c3   :  { %v2060_v32 = vsel %vm2048_vm3, %v1730_v14, -1e+30 }
 0x2c4   :  { %v2090_v43 = vmax.f32 %v1726_v48, %v2060_v32  ;;  %v2013_v34 = vrot.slane %v2012_v17, 4  ;;  %v1769_v32 = vpop.f32.mrf.mxu0 }
 0x2c7   :  { %v1620_v26 = vpop.f32.mrf.mxu1 }
 0x2c9   :  { %v1622_v49 = vpop.f32.mrf.mxu1 }
 0x2ca   :  { %v1736_v2 = vadd.f32 %v4770_v46, %v1622_v49  ;;  %v2001_v49 = vrot.slane %v2000_v38, 2 }
 0x2cb   :  { %v1624_v5 = vpop.f32.mrf.mxu1 }
 0x2cc   :  { %v1738_v59 = vadd.f32 %v4775_v16, %v1624_v5  ;;  %v1716_v16 = vadd.f32 %v4728_v25, %v4782_v10  ;;  %v1734_v25 = vadd.f32 %v4767_v33, %v1620_v26  ;;  %v2078_v10 = vmax.f32 %v2076_v36, %v2077_v41 }
 0x2cd   :  { %v1626_v60 = vpop.f32.mrf.mxu1  ;;  %v2073_v33 = vmax.f32 %v2071_v47, %v2072_v58  ;;  %v2091_v36 = vrot.slane %v2090_v43, 4  ;;  %v2266_v47 = vsub.s32 1, %v4785_v61  ;;  %v2014_v58 = vmax.f32 %v2012_v17, %v2013_v34 }
 0x2ce   :  { %v1740_v62 = vadd.f32 %v4780_v29, %v1626_v60  ;;  %v1984_v29 = vsel %vm1970_vm1, %v1738_v59, -1e+30  ;;  %v2083_v4 = vmax.f32 %v1716_v16, %v2058_v39  ;;  %v2079_v51 = vrot.slane %v2078_v10, 2 }
 0x2cf   :  { %v2019_v40 = vmax.f32 %v1734_v25, %v1984_v29  ;;  %v2074_v27 = vrot.slane %v2073_v33, 1  ;;  %v4890_v13 = vmax.f32 %v2000_v38, %v2001_v49  ;;  %v2092_v16 = vmax.f32 %v2090_v43, %v2091_v36 }
 0x2d0   :  { %v2062_v15 = vsel %vm2048_vm3, %v1740_v62, -1e+30  ;;  %v2084_v52 = vrot.slane %v2083_v4, 4  ;;  %v4892_v39 = vmax.f32 %v2078_v10, %v2079_v51 }
 0x2d1   :  { %v4901_v25 = vmax.f32 %v2073_v33, %v2074_v27 }
 0x2d4   :  { %v1630_v31 = vpop.f32.mrf.mxu1 }
 0x2d5   :  { %v1744_v12 = vadd.f32 %v4790_v44, %v1630_v31  ;;  %v2097_v44 = vmax.f32 %v1736_v2, %v2062_v15  ;;  %v2085_v31 = vmax.f32 %v2083_v4, %v2084_v52  ;;  %v2015_v4 = vrot.slane %v2014_v58, 2  ;;  %v4905_v2 = vpop.f32.mrf.mxu0 }
 0x2d6   :  { %v1632_v0 = vpop.f32.mrf.mxu1 }
 0x2d7   :  { %v1746_v26 = vadd.f32 %v4798_v42, %v1632_v0  ;;  %v4887_v42 = vmax.f32 %v1995_v19, %v1996_v20  ;;  %v2098_v41 = vrot.slane %v2097_v44, 4  ;;  %v4910_v27 = vpop.f32.mrf.mxu0 }
 0x2d8   :  { %v1634_v11 = vpop.f32.mrf.mxu1 }
 0x2d9   :  { %v1748_v30 = vadd.f32 %v4813_v23, %v1634_v11  ;;  %v2006_v23 = vrot.slane %v2005_v53, 4  ;;  %v2086_v11 = vrot.slane %v2085_v31, 2  ;;  %v2099_v17 = vmax.f32 %v2097_v44, %v2098_v41 }
 0x2da   :  { %v1636_v35 = vpop.f32.mrf.mxu1 }
 0x2db   :  { %v1986_v37 = vsel %vm1970_vm1, %v1748_v30, -1e+30  ;;  %v1750_v54 = vadd.f32 %v4824_v1, %v1636_v35  ;;  %v2020_v1 = vrot.slane %v2019_v40, 4  ;;  %v2007_v14 = vmax.f32 %v2005_v53, %v2006_v23 }
 0x2dc   :  { %v2026_v5 = vmax.f32 %v1744_v12, %v1986_v37  ;;  %v1640_v3 = vpop.f32.mrf.mxu1  ;;  %v2081_v12 = vrot.slane %v4892_v39, 1  ;;  %v2093_v35 = vrot.slane %v2092_v16, 2  ;;  %v2087_v33 = vmax.f32 %v2085_v31, %v2086_v11 }
 0x2dd   :  { %v2064_v46 = vsel %vm2048_vm3, %v1750_v54, -1e+30  ;;  %v1754_v62 = vadd.f32 %v4829_v21, %v1640_v3  ;;  %v2021_v19 = vmax.f32 %v2019_v40, %v2020_v1  ;;  %v2008_v53 = vrot.slane %v2007_v14, 2 }
 0x2de   :  { %v2104_v9 = vmax.f32 %v1746_v26, %v2064_v46  ;;  %v1642_v60 = vpop.f32.mrf.mxu1  ;;  %v2027_v28 = vrot.slane %v2026_v5, 4  ;;  %v2100_v3 = vrot.slane %v2099_v17, 2 }
 0x2df   :  { %v2009_v40 = vmax.f32 %v2007_v14, %v2008_v53  ;;  %v4920_v53 = vpop.f32.mrf.mxu0 }
 0x2e0   :  { %v1644_v59 = vpop.f32.mrf.mxu1  ;;  %v2105_v56 = vrot.slane %v2104_v9, 4  ;;  %v2028_v48 = vmax.f32 %v2026_v5, %v2027_v28  ;;  %v2016_v5 = vmax.f32 %v2014_v58, %v2015_v4  ;;  %v2082_v4 = vmax.f32 %v4892_v39, %v2081_v12 }
 0x2e1   :  { %v1758_v8 = vadd.f32 %v4841_v45, %v1644_v59  ;;  %v1756_v45 = vadd.f32 %v4833_v24, %v1642_v60  ;;  %v2022_v24 = vrot.slane %v2021_v19, 2  ;;  %v2010_v58 = vrot.slane %v2009_v40, 1 }
 0x2e2   :  { %v1646_v0 = vpop.f32.mrf.mxu1  ;;  %v2106_v30 = vmax.f32 %v2104_v9, %v2105_v56  ;;  %v2029_v37 = vrot.slane %v2028_v48, 2  ;;  %v2094_v9 = vmax.f32 %v2092_v16, %v2093_v35  ;;  %v2017_v56 = vrot.slane %v2016_v5, 1 }
 0x2e3   :  { %v1988_v20 = vsel %vm1970_vm1, %v1758_v8, -1e+30  ;;  %v1760_v57 = vadd.f32 %v4847_v55, %v1646_v0  ;;  %v2003_v55 = vrot.slane %v4890_v13, 1  ;;  %v2023_v60 = vmax.f32 %v2021_v19, %v2022_v24 }
 0x2e4   :  { %v2033_v38 = vmax.f32 %v1754_v62, %v1988_v20  ;;  %v1650_v29 = vpop.f32.mrf.mxu1  ;;  %v2107_v34 = vrot.slane %v2106_v30, 2  ;;  %v2030_v14 = vmax.f32 %v2028_v48, %v2029_v37  ;;  %v2095_v48 = vrot.slane %v2094_v9, 1 }
 0x2e5   :  { %v2066_v21 = vsel %vm2048_vm3, %v1760_v57, -1e+30  ;;  %v1764_v49 = vadd.f32 %v4865_v63, %v1650_v29  ;;  %v2101_v63 = vmax.f32 %v2099_v17, %v2100_v3  ;;  %v2004_v20 = vmax.f32 %v4890_v13, %v2003_v55 }
 0x2e6   :  { %v2034_v10 = vrot.slane %v2033_v38, 4  ;;  %v2111_v43 = vmax.f32 %v1756_v45, %v2066_v21  ;;  %v1652_v15 = vpop.f32.mrf.mxu1  ;;  %v2108_v62 = vmax.f32 %v2106_v30, %v2107_v34  ;;  %v2024_v57 = vrot.slane %v2023_v60, 1 }
 0x2e7   :  { %v2031_v45 = vrot.slane %v2030_v14, 1  ;;  %v2011_v17 = vmax.f32 %v2009_v40, %v2010_v58  ;;  %v2102_v21 = vrot.slane %v2101_v63, 1  ;;  %v2212_v35 = vsel %vm2211_vm4, %v2004_v20, %v4887_v42 }
 0x2e8   :  { %v2035_v54 = vmax.f32 %v2033_v38, %v2034_v10  ;;  %v2112_v23 = vrot.slane %v2111_v43, 4  ;;  %v1654_v26 = vpop.f32.mrf.mxu1  ;;  %v2018_v10 = vmax.f32 %v2016_v5, %v2017_v56  ;;  %v2025_v37 = vmax.f32 %v2023_v60, %v2024_v57  ;;  %v4936_v5 = vld [vmem:[%s5043_s3] sm:$0x7] }
 0x2e9   :  { %v1768_v52 = vadd.f32 %v1767_v7, %v1654_v26  ;;  %v1766_v7 = vadd.f32 %v4880_v22, %v1652_v15  ;;  %v2088_v22 = vrot.slane %v2087_v33, 1  ;;  %v2096_v26 = vmax.f32 %v2094_v9, %v2095_v48 }
 0x2ea   :  { %v2036_v44 = vrot.slane %v2035_v54, 2  ;;  %v2113_v46 = vmax.f32 %v2111_v43, %v2112_v23  ;;  %v1656_v51 = vpop.f32.mrf.mxu1  ;;  %v2109_v43 = vrot.slane %v2108_v62, 1  ;;  %v4929_v23 = vpop.f32.mrf.mxu0  ;;  %v2032_v3 = vmax.f32 %v2030_v14, %v2031_v45 }
 0x2eb   :  { %v1990_v36 = vsel %vm1970_vm1, %v1768_v52, -1e+30  ;;  %v1770_v1 = vadd.f32 %v1769_v32, %v1656_v51  ;;  %v2089_v24 = vmax.f32 %v2087_v33, %v2088_v22  ;;  %v2234_v52 = vsel %vm2211_vm4, %v2082_v4, %v4901_v25 }
 0x2ec   :  { %v2114_v28 = vrot.slane %v2113_v46, 2  ;;  %v2040_v59 = vmax.f32 %v1764_v49, %v1990_v36  ;;  %v4913_v31 = vpop.f32.mrf.mxu1  ;;  %v2037_v41 = vmax.f32 %v2035_v54, %v2036_v44  ;;  %v2214_v42 = vsel %vm2213_vm5, %v2011_v17, %v2212_v35  ;;  %v4947_v25 = vpop.f32.mrf.mxu0 }
 0x2ed   :  { %v2068_v8 = vsel %vm2048_vm3, %v1770_v1, -1e+30  ;;  %v2103_v33 = vmax.f32 %v2101_v63, %v2102_v21  ;;  %v2216_v44 = vsel %vm2215_vm7, %v2018_v10, %v2214_v42  ;;  %v2235_v60 = vsel %vm2213_vm5, %v2089_v24, %v2234_v52 }
 0x2ee   :  { %v2041_v0 = vrot.slane %v2040_v59, 4  ;;  %v2118_v16 = vmax.f32 %v1766_v7, %v2068_v8  ;;  %v4917_v19 = vpop.f32.mrf.mxu1  ;;  %v2115_v32 = vmax.f32 %v2113_v46, %v2114_v28  ;;  %v2038_v30 = vrot.slane %v2037_v41, 1  ;;  %v1919_v57 = vpop.f32.mrf.mxu0 }
 0x2ef   :  { %v2110_v46 = vmax.f32 %v2108_v62, %v2109_v43  ;;  %v2218_v36 = vsel %vm2217_vm8, %v2025_v37, %v2216_v44  ;;  %v2263_v14 = vrot.slane %v4936_v5, %v2262_v18  ;;  %v2236_v28 = vsel %vm2215_vm7, %v2096_v26, %v2235_v60 }
 0x2f0   :  { %v2042_v38 = vmax.f32 %v2040_v59, %v2041_v0  ;;  %v2119_v29 = vrot.slane %v2118_v16, 4  ;;  %v4922_v11 = vpop.f32.mrf.mxu1  ;;  %v2116_v54 = vrot.slane %v2115_v32, 1  ;;  %v2039_v34 = vmax.f32 %v2037_v41, %v2038_v30  ;;  %v3182_v17 = vpop.f32.mrf.mxu0 }
 0x2f1   :  { %v2220_v63 = vsel %vm2219_vm9, %v2032_v3, %v2218_v36  ;;  %v2237_v8 = vsel %vm2217_vm8, %v2103_v33, %v2236_v28  ;;  %v2267_v56 = vrot.slane %v4936_v5, %v2266_v47 }
 0x2f2   :  { %v2043_v13 = vrot.slane %v2042_v38, 2  ;;  %v2120_v15 = vmax.f32 %v2118_v16, %v2119_v29  ;;  %v4925_v55 = vpop.f32.mrf.mxu1  ;;  %v2117_v1 = vmax.f32 %v2115_v32, %v2116_v54  ;;  %v2222_v41 = vsel %vm2221_vm10, %v2039_v34, %v2220_v63  ;;  %v1922_v43 = vpop.f32.mrf.mxu0 }
 0x2f3   :  { %v2238_v16 = vsel %vm2219_vm9, %v2110_v46, %v2237_v8  ;;  %v3033_v34 = vadd.f32 %v4925_v55, %v4922_v11  ;;  %v3030_v63 = vadd.f32 %v4917_v19, %v4913_v31 }
 0x2f4   :  { %v2044_v39 = vmax.f32 %v2042_v38, %v2043_v13  ;;  %v2121_v12 = vrot.slane %v2120_v15, 2  ;;  %v4931_v40 = vpop.f32.mrf.mxu1  ;;  %v2239_v20 = vsel %vm2221_vm10, %v2117_v1, %v2238_v16  ;;  %v3185_v35 = vpop.f32.mrf.mxu0 }
 0x2f5   :  { %v1907_v28 = vadd.f32 %v3033_v34, %v4929_v23  ;;  %v1904_v16 = vadd.f32 %v3030_v63, %v4910_v27 }
 0x2f6   :  { %v2045_v49 = vrot.slane %v2044_v39, 1  ;;  %v2122_v51 = vmax.f32 %v2120_v15, %v2121_v12  ;;  %v3035_v9 = vpop.f32.mrf.mxu1  ;;  %v1935_v54 = vpop.f32.mrf.mxu0 }
 0x2f7   :  { %v3036_v36 = vadd.f32 %v3035_v9, %v4931_v40 }
 0x2f8   :  { %v2046_v7 = vmax.f32 %v2044_v39, %v2045_v49  ;;  %v2123_v59 = vrot.slane %v2122_v51, 1  ;;  %v3037_v58 = vpop.f32.mrf.mxu1  ;;  %v3186_v39 = vpop.f32.mrf.mxu0 }
 0x2f9   :  { %v1912_v9 = vadd.f32 %v4905_v2, %v3036_v36 }
 0x2fa   :  { %v2124_v62 = vmax.f32 %v2122_v51, %v2123_v59  ;;  %v3038_v0 = vpop.f32.mrf.mxu1  ;;  %v2224_v18 = vsel %vm2223_vm11, %v2046_v7, %v2222_v41  ;;  %v1938_v46 = vpop.f32.mrf.mxu0 }
 0x2fb   :  { %v2275_v22 = vadd.f32 %v2263_v14, %v2224_v18  ;;  %v3039_v52 = vadd.f32 %v3038_v0, %v3037_v58 }
 0x2fc   :  { %v3040_v32 = vpop.f32.mrf.mxu1  ;;  %v2240_v48 = vsel %vm2223_vm11, %v2124_v62, %v2239_v20  ;;  %v4967_v58 = vpop.f32.mrf.mxu0  ;;  %v2132_v62 = vsel %vm2126_vm12, %v1907_v28, -1e+30 }
 0x2fd   :  { %v2276_v45 = vadd.f32 %v2267_v56, %v2240_v48  ;;  %v2278_v29 = vmax.f32 %v2275_v22, 0.0  ;;  %v1915_v60 = vadd.f32 %v4920_v53, %v3039_v52 }
 0x2fe   :  { %v3041_v38 = vpop.f32.mrf.mxu1  ;;  %v1951_v18 = vpop.f32.mrf.mxu0 }
 0x2ff   :  { %v2279_v4 = vmax.f32 %v2276_v45, 0.0  ;;  %v2281_v10 = vpack.c.bf16 %v2278_v29, %v2278_v29  ;;  %v3042_v7 = vadd.f32 %v3041_v38, %v3040_v32  ;;  %v2134_v53 = vsel %vm2126_vm12, %v1915_v60, -1e+30 }
 0x300   :  { %v3043_v21 = vpop.f32.mrf.mxu1  ;;  %v2154_v20 = vmax.f32 %v1912_v9, %v2134_v53  ;;  %v2147_v29 = vmax.f32 %v1904_v16, %v2132_v62 }
 0x301   :  { %v2282_v47 = vpack.c.bf16 %v2279_v4, %v2279_v4  ;;  %v1920_v31 = vadd.f32 %v3042_v7, %v1919_v57 }
 0x302   :  { %v3044_v30 = vpop.f32.mrf.mxu1  ;;  %v2155_v27 = vrot.slane %v2154_v20, 4 }
 0x303   :  { %2515 = vmatprep.mubr.bf16.mxu0 %v2282_v47  ;;  %v3045_v42 = vadd.f32 %v3044_v30, %v3043_v21  ;;  %v3190_v30 = vpop.f32.mrf.mxu0 }
 0x304   :  { %v3046_v13 = vpop.f32.mrf.mxu1  ;;  %2516 = vmatmul.mubr.bf16.vlgmr.msra.gmra.mxu0 %v2281_v10 }
 0x305   :  { %3219 = vmatprep.mubr.msk.bf16.mxu0 %vm3364_vm2, %v3363_v6  ;;  %v1923_v1 = vadd.f32 %v3045_v42, %v1922_v43 }
 0x306   :  { %v3047_v15 = vpop.f32.mrf.mxu1 }
 0x307   :  { %v3048_v11 = vadd.f32 %v3047_v15, %v3046_v13  ;;  %v2136_v23 = vsel %vm2126_vm12, %v1923_v1, -1e+30  ;;  %v2148_v13 = vrot.slane %v2147_v29, 4 }
 0x308   :  { %v3049_v24 = vpop.f32.mrf.mxu1  ;;  %v2161_v48 = vmax.f32 %v1920_v31, %v2136_v23 }
 0x309   :  { %v1928_v22 = vadd.f32 %v4947_v25, %v3048_v11 }
 0x30a   :  { %v3050_v37 = vpop.f32.mrf.mxu1  ;;  %v2162_v25 = vrot.slane %v2161_v48, 4 }
 0x30b   :  { %v3051_v44 = vadd.f32 %v3050_v37, %v3049_v24 }
 0x30c   :  { %v3052_v26 = vpop.f32.mrf.mxu1  ;;  %v2163_v52 = vmax.f32 %v2161_v48, %v2162_v25 }
 0x30d   :  { %v1931_v59 = vadd.f32 %v3182_v17, %v3051_v44 }
 0x30e   :  { %v3053_v3 = vpop.f32.mrf.mxu1  ;;  %v2164_v28 = vrot.slane %v2163_v52, 2 }
 0x30f   :  { %v3054_v40 = vadd.f32 %v3053_v3, %v3052_v26  ;;  %v2138_v19 = vsel %vm2126_vm12, %v1931_v59, -1e+30  ;;  %v1954_v3 = vpop.f32.mrf.mxu0 }
 0x310   :  { %v3055_v12 = vpop.f32.mrf.mxu1  ;;  %v2168_v4 = vmax.f32 %v1928_v22, %v2138_v19 }
 0x311   :  { %v1936_v45 = vadd.f32 %v3054_v40, %v1935_v54 }
 0x312   :  { %v3056_v33 = vpop.f32.mrf.mxu1  ;;  %v2169_v15 = vrot.slane %v2168_v4, 4 }
 0x313   :  { %v3057_v49 = vadd.f32 %v3056_v33, %v3055_v12  ;;  %v2149_v33 = vmax.f32 %v2147_v29, %v2148_v13 }
 0x314   :  { %v3058_v51 = vpop.f32.mrf.mxu1  ;;  %v2170_v34 = vmax.f32 %v2168_v4, %v2169_v15 }
 0x315   :  { %v1939_v55 = vadd.f32 %v3057_v49, %v1938_v46  ;;  %v2150_v7 = vrot.slane %v2149_v33, 2 }
 0x316   :  { %v3059_v14 = vpop.f32.mrf.mxu1  ;;  %v2171_v59 = vrot.slane %v2170_v34, 2 }
 0x317   :  { %v3060_v8 = vadd.f32 %v3059_v14, %v3058_v51  ;;  %v2140_v2 = vsel %vm2126_vm12, %v1939_v55, -1e+30  ;;  %v2151_v62 = vmax.f32 %v2149_v33, %v2150_v7 }
 0x318   :  { %v3061_v41 = vpop.f32.mrf.mxu1  ;;  %v2175_v21 = vmax.f32 %v1936_v45, %v2140_v2  ;;  %v2172_v31 = vmax.f32 %v2170_v34, %v2171_v59 }
 0x319   :  { %v1944_v57 = vadd.f32 %v3185_v35, %v3060_v8  ;;  %v2165_v8 = vmax.f32 %v2163_v52, %v2164_v28  ;;  %v2152_v45 = vrot.slane %v2151_v62, 1  ;;  %v2932_v28 = vld [vmem:[%s5046_s5] ss:$0 sm:$0xff] }
 0x31a   :  { %v3062_v56 = vpop.f32.mrf.mxu1  ;;  %v2176_v26 = vrot.slane %v2175_v21, 4 }
 0x31b   :  { %v3063_v0 = vadd.f32 %v3062_v56, %v3061_v41 }
 0x31c   :  { %v3064_v32 = vpop.f32.mrf.mxu1  ;;  %v2177_v49 = vmax.f32 %v2175_v21, %v2176_v26 }
 0x31d   :  { %v1947_v38 = vadd.f32 %v3186_v39, %v3063_v0  ;;  %v2156_v39 = vmax.f32 %v2154_v20, %v2155_v27  ;;  %v2153_v27 = vmax.f32 %v2151_v62, %v2152_v45 }
 0x31e   :  { %v3065_v17 = vpop.f32.mrf.mxu1  ;;  %v2178_v41 = vrot.slane %v2177_v49, 2 }
 0x31f   :  { %v2142_v47 = vsel %vm2126_vm12, %v1947_v38, -1e+30  ;;  %v3066_v24 = vadd.f32 %v3065_v17, %v3064_v32  ;;  %v2157_v60 = vrot.slane %v2156_v39, 2  ;;  %v2166_v32 = vrot.slane %v2165_v8, 1 }
 0x320   :  { %v2182_v10 = vmax.f32 %v1944_v57, %v2142_v47  ;;  %v3067_v43 = vpop.f32.mrf.mxu1  ;;  %v2173_v38 = vrot.slane %v2172_v31, 1 }
 0x321   :  { %v1952_v44 = vadd.f32 %v3066_v24, %v1951_v18  ;;  %v2158_v40 = vmax.f32 %v2156_v39, %v2157_v60  ;;  %v2179_v18 = vmax.f32 %v2177_v49, %v2178_v41  ;;  %v2167_v47 = vmax.f32 %v2165_v8, %v2166_v32  ;;  %v3353_v49 = vld [vmem:[%s5044_s6] sm:$0xff]  }
 0x322   :  { %v3068_v37 = vpop.f32.mrf.mxu1  ;;  %v2183_v12 = vrot.slane %v2182_v10, 4  ;;  %v15_v8 = vstv %s5047_s9 }
 0x323   :  { %v3069_v54 = vadd.f32 %v3068_v37, %v3067_v43  ;;  %v2159_v20 = vrot.slane %v2158_v40, 1  ;;  %v2180_v4 = vrot.slane %v2179_v18, 1  ;;  %16 = vst [vmem:[#allocation2] sm:$0x1] %v15_v8 }
 0x324   :  { %v3070_v35 = vpop.f32.mrf.mxu1  ;;  %v2184_v36 = vmax.f32 %v2182_v10, %v2183_v12 }
 0x325   :  { %v1955_v42 = vadd.f32 %v3069_v54, %v1954_v3  ;;  %v2160_v57 = vmax.f32 %v2158_v40, %v2159_v20  ;;  %v2181_v43 = vmax.f32 %v2179_v18, %v2180_v4  ;;  %v2271_v3 = vrot.slane %v4936_v5, %v2270_v50  ;;  %v3351_v5 = vld [vmem:[%s5044_s6 + $0x10] sm:$0xff]  }
 0x326   :  { %v3071_v46 = vpop.f32.mrf.mxu1  ;;  %v2185_v9 = vrot.slane %v2184_v36, 2 }
 0x327   :  { %v2144_v51 = vsel %vm2126_vm12, %v1955_v42, -1e+30  ;;  %v3072_v11 = vadd.f32 %v3071_v46, %v3070_v35  ;;  %v2250_v25 = vsel %vm2211_vm4, %v2160_v57, %v2153_v27  ;;  %v3352_v46 = vld [vmem:[%s5044_s6 + $0x8] sm:$0xff]  }
 0x328   :  { %v2189_v1 = vmax.f32 %v1952_v44, %v2144_v51  ;;  %v3073_v14 = vpop.f32.mrf.mxu1  ;;  %v2186_v22 = vmax.f32 %v2184_v36, %v2185_v9  ;;  %v2251_v24 = vsel %vm2213_vm5, %v2167_v47, %v2250_v25  ;;  %v3350_v44 = vld [vmem:[%s5044_s6 + $0x18] sm:$0xff]  }
 0x329   :  { %v1960_v0 = vadd.f32 %v4967_v58, %v3072_v11  ;;  %v2174_v58 = vmax.f32 %v2172_v31, %v2173_v38  ;;  %3212 = vmatpush3.bf16.msra.mxu0 %v3350_v44 }
 0x32a   :  { %v2190_v63 = vrot.slane %v2189_v1, 4  ;;  %v3074_v55 = vpop.f32.mrf.mxu1  ;;  %v2187_v17 = vrot.slane %v2186_v22, 1  ;;  %3213 = vmatprep.subr.bf16.mxu0 %v3363_v6  ;;  %v2963_v20 = vld [vmem:[#allocation2] ss:$0 sm:$0xff] }
 0x32b   :  { %v3075_v53 = vadd.f32 %v3074_v55, %v3073_v14  ;;  %v2252_v26 = vsel %vm2215_vm7, %v2174_v58, %v2251_v24 }
 0x32c   :  { %v2191_v23 = vmax.f32 %v2189_v1, %v2190_v63  ;;  %v2188_v13 = vmax.f32 %v2186_v22, %v2187_v17  ;;  %v2253_v39 = vsel %vm2217_vm8, %v2181_v43, %v2252_v26 }
 0x32d   :  { %v1963_v56 = vadd.f32 %v3190_v30, %v3075_v53  ;;  %3214 = vmatpush3.bf16.msra.mxu0 %v3351_v5  ;;  %v3354_v53 = vld [vmem:[%s5045_s8 + $0x8] sm:$0xff]  }
 0x32e   :  { %v2192_v19 = vrot.slane %v2191_v23, 2  ;;  %v2254_v12 = vsel %vm2219_vm9, %v2188_v13, %v2253_v39  ;;  %3215 = vmatprep.subr.bf16.mxu0 %v3363_v6 }
 0x32f   :  { %v2146_v16 = vsel %vm2126_vm12, %v1963_v56, -1e+30  ;;  %v2957_v56 = vld [vmem:[%s5048_s7] ss:$0 sm:$0xff] }
 0x330   :  { %v2196_v2 = vmax.f32 %v1960_v0, %v2146_v16  ;;  %v2193_v48 = vmax.f32 %v2191_v23, %v2192_v19  ;;  %v3355_v23 = vld [vmem:[%s5045_s8] sm:$0xff]  }
 0x331   :  { %3216 = vmatpush3.bf16.msra.mxu0 %v3352_v46 }
 0x332   :  { %v2197_v29 = vrot.slane %v2196_v2, 4  ;;  %v2194_v30 = vrot.slane %v2193_v48, 1  ;;  %3217 = vmatprep.subr.bf16.mxu0 %v3363_v6 }
 0x334   :  { %v2198_v21 = vmax.f32 %v2196_v2, %v2197_v29  ;;  %v2195_v37 = vmax.f32 %v2193_v48, %v2194_v30 }
 0x335   :  { %3218 = vmatpush3.bf16.msra.mxu0 %v3353_v49 }
 0x336   :  { %v2199_v10 = vrot.slane %v2198_v21, 2  ;;  %v2255_v61 = vsel %vm2221_vm10, %v2195_v37, %v2254_v12  ;;  %3223 = vmatprep.subr.bf16.mxu0 %v3363_v6 }
 0x338   :  { %v2200_v15 = vmax.f32 %v2198_v21, %v2199_v10 }
 0x33a   :  { %v2201_v54 = vrot.slane %v2200_v15, 1 }
 0x33c   :  { %v2202_v35 = vmax.f32 %v2200_v15, %v2201_v54 }
 0x33e   :  { %v2256_v52 = vsel %vm2223_vm11, %v2202_v35, %v2255_v61 }
 0x33f   :  { %v2277_v42 = vadd.f32 %v2271_v3, %v2256_v52 }
 0x341   :  { %v2280_v33 = vmax.f32 %v2277_v42, 0.0 }
 0x343   :  { %v2283_v34 = vpack.c.bf16 %v2280_v33, %v2280_v33 }
 0x345   :  { %3208 = vmatmul.mubr.bf16.vlgmr.msra.gmra.mxu1 %v2283_v34 }
 0x3c4   :  { %v3104_v51 = vpop.f32.mrf.mxu0 }
 0x3c6   :  { %v3105_v60 = vpop.f32.mrf.mxu0 }
 0x3c7   :  { %v3106_v14 = vadd.f32 %v3105_v60, %v3104_v51 }
 0x3c8   :  { %v3107_v36 = vpop.f32.mrf.mxu0 }
 0x3c9   :  { %v2518_v7 = vadd.f32 %v3106_v14, %v2932_v28 }
 0x3ca   :  { %v3108_v1 = vpop.f32.mrf.mxu0 }
 0x405   :  { %v2557_v59 = vpop.f32.mrf.mxu1 }
 0x406   :  { %v2558_v63 = vadd.f32 %v2557_v59, %v2518_v7 }
 0x407   :  { %v3209_v11 = vpop.f32.mrf.mxu1 }
 0x408   :  { %v2563_v55 = vmax.f32 %v2558_v63, 0.0 }
 0x409   :  { %v2560_v41 = vpop.f32.mrf.mxu1 }
 0x40a   :  { %v2564_v40 = vpack.c.bf16 %v2563_v55, %v2563_v55 }
 0x40b   :  { %v3210_v9 = vpop.f32.mrf.mxu1 }
 0x40c   :  { %3220 = vmatmul.mubr.msk.bf16.vlgmr.msra.gmra.mxu0 %vm1057_vm6, %v2564_v40  ;;  %vm2672_vm6 = vcmask 261120  }
 0x40d   :  { %3224 = vmatpush3.bf16.msra.mxu0 %v3354_v53  ;;  %3227 = vmatprep.mubr.msk.bf16.mxu0 %vm3364_vm2, %v3363_v6 }
 0x40e   :  { %3225 = vmatprep.subr.bf16.mxu0 %v3363_v6 }
 0x411   :  { %3226 = vmatpush3.bf16.msra.mxu0 %v3355_v23 }
 0x4cc   :  { %v2641_v62 = vpop.f32.mrf.mxu0 }
 0x4cd   :  { %v2642_v31 = vadd.f32 %v2957_v56, %v2641_v62 }
 0x4ce   :  { %v3221_v19 = vpop.f32.mrf.mxu0 }
 0x4cf   :  { %v2647_v0 = vmax.f32 %v2642_v31, 0.0 }
 0x4d0   :  { %v2644_v18 = vpop.f32.mrf.mxu0 }
 0x4d1   :  { %v2648_v6 = vpack.c.bf16 %v2647_v0, %v2647_v0 }
 0x4d2   :  { %v3222_v16 = vpop.f32.mrf.mxu0 }
 0x4d3   :  { %3228 = vmatmul.mubr.msk.bf16.vlgmr.msra.gmra.mxu0 %vm2672_vm6, %v2648_v6 }
 0x593   :  { %v2710_v22 = vpop.f32.mrf.mxu0 }
 0x594   :  { %v2711_v2 = vadd.f32 %v2963_v20, %v2710_v22 }
 0x595   :  { %v3229_v32 = vpop.f32.mrf.mxu0 }
 0x596   :  { %v2967_v48 = vmul.f32 -1.442695, %v2711_v2 }
 0x597   :  { %v2713_v45 = vpop.f32.mrf.mxu0 }
 0x598   :  { %3356 = vpow2.f32 %v2967_v48 }
 0x599   :  { %v3230_v38 = vpop.f32.mrf.mxu0 }
 0x5a5   :  { %v3357_v29 = vpop.eup %3356 }
 0x5a6   :  { %v2719_v4 = vadd.f32 1.0, %v3357_v29 }
 0x5a8   :  { %3358 = vrcp.f32 %v2719_v4 }
 0x5b5   :  { %v3359_v57 = vpop.eup %3358 }
 0x5b6   :  { %2723 = vst.msk [vmem:[%s5049_s10] sm:$0xff] %vm2722_vm13, %v3359_v57 }

</bundles_post_ra>
